<compile_context>
chip_gen: v5e
topology: v5e:2x2
jax: 0.10.0
libtpu: 0.0.40
codegen_flags: <defaults>
</compile_context>

<pallas_src>
import jax
import jax.numpy as jnp
from jax.experimental import pallas as pl
from jax.experimental.pallas import tpu as pltpu

CIN = 3
COUT = 8
KH = KW = 3


def _u_decomp(u):
    """Tap offset u = p + dh - 1 (u in [-1, 2]) -> (phase parity, phase shift, (p, dh) pairs)."""
    ru = u % 2                      # python: -1 % 2 == 1
    au = (u - ru) // 2              # in {-1, 0, 1}
    pairs = [(p, u + 1 - p) for p in (0, 1) if 0 <= u + 1 - p < KH]
    return ru, au, pairs


_U_INFO = tuple(_u_decomp(u) for u in (-1, 0, 1, 2))


# ---------------------------------------------------------------------------
# Pallas kernel: fused conv3x3 + bias + ReLU + 2x2 maxpool (pool-phase form)
# ---------------------------------------------------------------------------
def _make_kernel(Nb, Ho, Wo):
    HoWo = Ho * Wo
    Lb = Nb * HoWo

    def kernel(xph_ref, rc_ref, w_ref, b_ref, o_ref):
        # xph_ref: (4*CIN, Lb) f32. Row ph*CIN + c (ph = ru*2 + rv) = pool-phase (ru, rv) of input
        #          channel c, flattened over (n, i, j)  -> lane-dense tap source.
        # rc_ref:  (2, Lb) i32.   Row 0 = output-row index i, row 1 = output-col index j per lane.
        # w_ref:   (CIN*KH*KW, COUT, 1) f32.  Row c*9 + dh*3 + dw = conv_w[:, c, dh, dw, None].
        # b_ref:   (COUT, 1) f32.
        # o_ref:   (Nb, COUT, HoWo) f32  (NCHW with flattened spatial).
        ri = rc_ref[pl.ds(0, 1), :]                       # (1, Lb)
        ci = rc_ref[pl.ds(1, 1), :]                       # (1, Lb)
        row_ok = {-1: ri >= 1, 0: None, 1: ri <= Ho - 2}  # conv zero-pad border masks
        col_ok = {-1: ci >= 1, 0: None, 1: ci <= Wo - 2}

        # Four pool-position accumulators: output channels on sublanes, (n, i, j) on lanes.
        accs = [jnp.zeros((COUT, Lb), jnp.float32) for _ in range(4)]

        for ru, au, hpairs in _U_INFO:
            for rv, av, wpairs in _U_INFO:
                ph = ru * 2 + rv
                delta = au * Wo + av
                mask = None
                if row_ok[au] is not None:
                    mask = row_ok[au]
                if col_ok[av] is not None:
                    mask = col_ok[av] if mask is None else (mask & col_ok[av])
                for c in range(CIN):
                    src = xph_ref[pl.ds(ph * CIN + c, 1), :]              # (1, Lb)
                    tap = src if delta == 0 else pltpu.roll(src, (-delta) % Lb, axis=1)
                    if mask is not None:
                        tap = jnp.where(mask, tap, 0.0)
                    # Tap built once; reused for every (pool position, kernel tap) and all 8
                    # output channels via the (COUT, 1) weight-column broadcast.
                    for p, dh in hpairs:
                        for q, dw in wpairs:
                            wv = w_ref[c * (KH * KW) + dh * KW + dw]      # (COUT, 1)
                            k = p * 2 + q
                            accs[k] = accs[k] + wv * tap                  # (COUT, Lb) MAC

        # 2x2 max-pool == max over the 4 pool positions; bias + ReLU commute with the max.
        pooled = jnp.maximum(jnp.maximum(accs[0], accs[1]),
                             jnp.maximum(accs[2], accs[3]))
        pooled = jnp.maximum(pooled + b_ref[...], 0.0)

        for n in range(Nb):
            o_ref[n] = pooled[:, n * HoWo:(n + 1) * HoWo]                 # (COUT, HoWo)

    return kernel


# ---------------------------------------------------------------------------
# Chip-aware block sizing
# ---------------------------------------------------------------------------
def _round128(v):
    return ((v + 127) // 128) * 128


def _block_vmem_bytes(nb, howo):
    """VMEM estimate for one grid block, including (8,128) tile padding."""
    lb = _round128(nb * howo)
    in_b = 16 * lb * 4                        # phase planes: 12 rows -> 16 sublanes
    rc_b = 8 * lb * 4                         # row/col index rows: 2 -> 8 sublanes
    out_b = nb * COUT * _round128(howo) * 4   # output block
    acc_b = 4 * COUT * lb * 4                 # four (COUT, Lb) f32 accumulators
    tmp_b = 2 * COUT * lb * 4                 # tap / MAC temporaries headroom
    fixed = (CIN * KH * KW + 1) * 8 * 128 * 4  # weights + bias, tile-padded
    return 2 * (in_b + rc_b + out_b) + acc_b + tmp_b + fixed   # x2: double buffering


def _is_single_tensorcore():
    try:
        kind = jax.devices()[0].device_kind.lower()
    except Exception:
        return False
    return any(t in kind for t in ("v5e", "v5 lite", "v5lite", "v6e", "v6 lite", "v6lite"))


def _vmem_limit_bytes():
    try:
        cap = int(pltpu.get_tpu_info().vmem_capacity_bytes)
    except Exception:
        cap = 0
    if cap <= 0:
        return 32 * 1024 * 1024
    return int(min(64 * 1024 * 1024, cap // 2))


def _pick_batch_block(n, howo, single_core):
    budget = (24 if single_core else 8) * 1024 * 1024
    # Lane-axis blocking of the (12, N*HoWo) input requires Nb*HoWo % 128 == 0 unless Nb == N.
    valid = [nb for nb in range(1, n + 1)
             if n % nb == 0 and (nb == n or (nb * howo) % 128 == 0)]
    if (not single_core) and n >= 2:
        pref = [nb for nb in valid if n // nb >= 2]   # keep >=2 blocks for 2 TensorCores
        if pref:
            valid = pref
    fitting = [nb for nb in valid if _block_vmem_bytes(nb, howo) <= budget]
    cands = fitting if fitting else valid[:1]

    def rank(nb):
        blocks = n // nb
        balanced = single_core or blocks == 1 or blocks % 2 == 0
        return (0 if balanced else 1, -nb)            # prefer balanced grids, then larger blocks

    return min(cands, key=rank)


# ---------------------------------------------------------------------------
# Wrapper
# ---------------------------------------------------------------------------
def cnn_extractor_forward(x, conv_w, conv_b):
    """PyTorch CNN_extractor.forward: conv3x3(pad=1) -> ReLU -> maxpool2x2 -> dropout (eval).

    x: (N, 3, H, W) NCHW -> (N, 8, H//2, W//2) NCHW.
    """
    N, C, H, W = x.shape
    assert C == CIN and H % 2 == 0 and W % 2 == 0, (C, H, W)
    Ho, Wo = H // 2, W // 2
    HoWo = Ho * Wo

    x = x.astype(jnp.float32)

    # 2x2 pool-phase decomposition of the *unpadded* input (same total size as x): channel on the
    # sublane axis, (batch, out-row, out-col) folded into one lane-dense axis.
    #   xph[ph*CIN + c, n*HoWo + i*Wo + j] = x[n, c, 2*i + ru, 2*j + rv],  ph = ru*2 + rv.
    phases = jnp.stack([x[:, :, r::2, s::2] for r in (0, 1) for s in (0, 1)], axis=0)
    xph = phases.transpose(0, 2, 1, 3, 4).reshape(4 * CIN, N * HoWo)

    # Per-lane output-row / output-col indices (drive the conv zero-pad border masks in-kernel).
    ri = jnp.broadcast_to(jnp.arange(Ho, dtype=jnp.int32)[:, None], (Ho, Wo)).reshape(-1)
    ci = jnp.broadcast_to(jnp.arange(Wo, dtype=jnp.int32)[None, :], (Ho, Wo)).reshape(-1)
    rc = jnp.tile(jnp.stack([ri, ci], axis=0), (1, N))                     # (2, N*HoWo)

    # Weight columns: w_vecs[c*9 + dh*3 + dw] = conv_w[:, c, dh, dw, None]  -> (COUT, 1) each.
    w_vecs = jnp.transpose(conv_w.astype(jnp.float32), (1, 2, 3, 0)).reshape(CIN * KH * KW, COUT, 1)
    b_vec = conv_b.astype(jnp.float32).reshape(COUT, 1)

    single_core = _is_single_tensorcore()
    Nb = _pick_batch_block(N, HoWo, single_core)
    Lb = Nb * HoWo
    grid = (N // Nb,)

    out = pl.pallas_call(
        _make_kernel(Nb, Ho, Wo),
        out_shape=jax.ShapeDtypeStruct((N, COUT, HoWo), jnp.float32),
        grid_spec=pltpu.PrefetchScalarGridSpec(
            num_scalar_prefetch=0,
            grid=grid,
            in_specs=[
                pl.BlockSpec((4 * CIN, Lb), lambda g: (0, g)),
                pl.BlockSpec((2, Lb), lambda g: (0, g)),
                pl.BlockSpec((CIN * KH * KW, COUT, 1), lambda g: (0, 0, 0)),
                pl.BlockSpec((COUT, 1), lambda g: (0, 0)),
            ],
            out_specs=pl.BlockSpec((Nb, COUT, HoWo), lambda g: (g, 0, 0)),
        ),
        compiler_params=pltpu.CompilerParams(
            dimension_semantics=("parallel",),
            vmem_limit_bytes=_vmem_limit_bytes(),
        ),
    )(xph, rc, w_vecs, b_vec)

    # Free contiguous reshape back to NCHW.  Dropout: identity (eval-mode), see TODO(synk) above.
    return out.reshape(N, COUT, Ho, Wo)


# ---------------------------------------------------------------------------
# Pure-JAX reference (for correctness check)
# ---------------------------------------------------------------------------
def _reference_forward(x, conv_w, conv_b):
    y = jax.lax.conv_general_dilated(
        x, conv_w, window_strides=(1, 1), padding=((1, 1), (1, 1)),
        dimension_numbers=("NCHW", "OIHW", "NCHW"))
    y = y + conv_b[None, :, None, None]
    y = jnp.maximum(y, 0.0)
    y = jax.lax.reduce_window(
        y, -jnp.inf, jax.lax.max,
        window_dimensions=(1, 1, 2, 2), window_strides=(1, 1, 2, 2), padding="VALID")
    return y


if __name__ == "__main__":
    key = jax.random.PRNGKey(0)
    kx, kw, kb = jax.random.split(key, 3)

    # Small shapes consistent with the module: batch=2, Cin=3 (required by conv1), spatial=16.
    N, C, H, W = 2, 3, 16, 16
    x = jax.random.normal(kx, (N, C, H, W), dtype=jnp.float32)

    # Deterministic parameter init for Conv2d(3, 8, 3, padding=1); the classifier params are
    # defined in __init__ but never used by forward, so they are not materialized.
    fan_in = C * KH * KW
    bound = 1.0 / (fan_in ** 0.5)
    conv_w = jax.random.uniform(kw, (COUT, C, KH, KW), minval=-bound, maxval=bound,
                                dtype=jnp.float32)
    conv_b = jax.random.uniform(kb, (COUT,), minval=-bound, maxval=bound, dtype=jnp.float32)

    fwd = jax.jit(cnn_extractor_forward)
    out = jax.block_until_ready(fwd(x, conv_w, conv_b))

    ref = _reference_forward(x, conv_w, conv_b)
    assert out.shape == (N, COUT, H // 2, W // 2), out.shape
    max_err = float(jnp.max(jnp.abs(out - ref)))
    assert jnp.allclose(out, ref, rtol=1e-3, atol=1e-3), max_err

    print("KERNEL_OK")
</pallas_src>

<mosaic_0001>
module attributes {stable_mosaic.version = 11 : i64} {
  func.func @kernel(%arg0: i32, %arg1: memref<12x128xf32, #tpu.memory_space<vmem>>, %arg2: memref<2x128xi32, #tpu.memory_space<vmem>>, %arg3: memref<27x8x1xf32, #tpu.memory_space<vmem>>, %arg4: memref<8x1xf32, #tpu.memory_space<vmem>>, %arg5: memref<2x8x64xf32, #tpu.memory_space<vmem>>) attributes {dimension_semantics = [#tpu.dimension_semantics<parallel>], iteration_bounds = array<i64: 1>, scalar_prefetch = 0 : i64, scratch_operands = 0 : i64, tpu.core_type = #tpu.core_type<tc>, window_params = [{transform_indices = @transform_0, window_bounds = array<i64: 12, 128>}, {transform_indices = @transform_1, window_bounds = array<i64: 2, 128>}, {pipeline_mode = #tpu.pipeline_mode<synchronous>, transform_indices = @transform_2, window_bounds = array<i64: 27, 8, 1>}, {pipeline_mode = #tpu.pipeline_mode<synchronous>, transform_indices = @transform_3, window_bounds = array<i64: 8, 1>}, {transform_indices = @transform_4, window_bounds = array<i64: 2, 8, 64>}]} {
    %c0 = arith.constant 0 : index
    %c0_0 = arith.constant 0 : index
    %0 = vector.load %arg2[%c0, %c0_0] : memref<2x128xi32, #tpu.memory_space<vmem>>, vector<1x128xi32>
    %c1 = arith.constant 1 : index
    %c0_1 = arith.constant 0 : index
    %1 = vector.load %arg2[%c1, %c0_1] : memref<2x128xi32, #tpu.memory_space<vmem>>, vector<1x128xi32>
    %c1_i32 = arith.constant 1 : i32
    %2 = vector.broadcast %c1_i32 : i32 to vector<1x128xi32>
    %3 = arith.cmpi sge, %0, %2 : vector<1x128xi32>
    %c6_i32 = arith.constant 6 : i32
    %4 = vector.broadcast %c6_i32 : i32 to vector<1x128xi32>
    %5 = arith.cmpi sle, %0, %4 : vector<1x128xi32>
    %c1_i32_2 = arith.constant 1 : i32
    %6 = vector.broadcast %c1_i32_2 : i32 to vector<1x128xi32>
    %7 = arith.cmpi sge, %1, %6 : vector<1x128xi32>
    %c6_i32_3 = arith.constant 6 : i32
    %8 = vector.broadcast %c6_i32_3 : i32 to vector<1x128xi32>
    %9 = arith.cmpi sle, %1, %8 : vector<1x128xi32>
    %cst = arith.constant 0.000000e+00 : f32
    %10 = vector.broadcast %cst : f32 to vector<8x128xf32>
    %cst_4 = arith.constant 0.000000e+00 : f32
    %11 = vector.broadcast %cst_4 : f32 to vector<8x128xf32>
    %cst_5 = arith.constant 0.000000e+00 : f32
    %12 = vector.broadcast %cst_5 : f32 to vector<8x128xf32>
    %cst_6 = arith.constant 0.000000e+00 : f32
    %13 = vector.broadcast %cst_6 : f32 to vector<8x128xf32>
    %14 = arith.andi %3, %7 : vector<1x128xi1>
    %c9 = arith.constant 9 : index
    %c0_7 = arith.constant 0 : index
    %15 = vector.load %arg1[%c9, %c0_7] : memref<12x128xf32, #tpu.memory_space<vmem>>, vector<1x128xf32>
    %c9_i32 = arith.constant 9 : i32
    %16 = tpu.dynamic_rotate %15 by %c9_i32 dim 1 : vector<1x128xf32>, i32 -> vector<1x128xf32>
    %cst_8 = arith.constant 0.000000e+00 : f32
    %17 = vector.broadcast %cst_8 : f32 to vector<1x128xf32>
    %18 = arith.select %14, %16, %17 : vector<1x128xi1>, vector<1x128xf32>
    %c0_9 = arith.constant 0 : index
    %c0_10 = arith.constant 0 : index
    %c0_11 = arith.constant 0 : index
    %19 = vector.load %arg3[%c0_9, %c0_10, %c0_11] : memref<27x8x1xf32, #tpu.memory_space<vmem>>, vector<1x8x1xf32>
    %20 = vector.shape_cast %19 : vector<1x8x1xf32> to vector<8x1xf32>
    %21 = vector.broadcast %20 : vector<8x1xf32> to vector<8x128xf32>
    %22 = vector.broadcast %18 : vector<1x128xf32> to vector<8x128xf32>
    %23 = arith.mulf %21, %22 : vector<8x128xf32>
    %24 = arith.addf %10, %23 : vector<8x128xf32>
    %c10 = arith.constant 10 : index
    %c0_12 = arith.constant 0 : index
    %25 = vector.load %arg1[%c10, %c0_12] : memref<12x128xf32, #tpu.memory_space<vmem>>, vector<1x128xf32>
    %c9_i32_13 = arith.constant 9 : i32
    %26 = tpu.dynamic_rotate %25 by %c9_i32_13 dim 1 : vector<1x128xf32>, i32 -> vector<1x128xf32>
    %cst_14 = arith.constant 0.000000e+00 : f32
    %27 = vector.broadcast %cst_14 : f32 to vector<1x128xf32>
    %28 = arith.select %14, %26, %27 : vector<1x128xi1>, vector<1x128xf32>
    %c9_15 = arith.constant 9 : index
    %c0_16 = arith.constant 0 : index
    %c0_17 = arith.constant 0 : index
    %29 = vector.load %arg3[%c9_15, %c0_16, %c0_17] : memref<27x8x1xf32, #tpu.memory_space<vmem>>, vector<1x8x1xf32>
    %30 = vector.shape_cast %29 : vector<1x8x1xf32> to vector<8x1xf32>
    %31 = vector.broadcast %30 : vector<8x1xf32> to vector<8x128xf32>
    %32 = vector.broadcast %28 : vector<1x128xf32> to vector<8x128xf32>
    %33 = arith.mulf %31, %32 : vector<8x128xf32>
    %34 = arith.addf %24, %33 : vector<8x128xf32>
    %c11 = arith.constant 11 : index
    %c0_18 = arith.constant 0 : index
    %35 = vector.load %arg1[%c11, %c0_18] : memref<12x128xf32, #tpu.memory_space<vmem>>, vector<1x128xf32>
    %c9_i32_19 = arith.constant 9 : i32
    %36 = tpu.dynamic_rotate %35 by %c9_i32_19 dim 1 : vector<1x128xf32>, i32 -> vector<1x128xf32>
    %cst_20 = arith.constant 0.000000e+00 : f32
    %37 = vector.broadcast %cst_20 : f32 to vector<1x128xf32>
    %38 = arith.select %14, %36, %37 : vector<1x128xi1>, vector<1x128xf32>
    %c18 = arith.constant 18 : index
    %c0_21 = arith.constant 0 : index
    %c0_22 = arith.constant 0 : index
    %39 = vector.load %arg3[%c18, %c0_21, %c0_22] : memref<27x8x1xf32, #tpu.memory_space<vmem>>, vector<1x8x1xf32>
    %40 = vector.shape_cast %39 : vector<1x8x1xf32> to vector<8x1xf32>
    %41 = vector.broadcast %40 : vector<8x1xf32> to vector<8x128xf32>
    %42 = vector.broadcast %38 : vector<1x128xf32> to vector<8x128xf32>
    %43 = arith.mulf %41, %42 : vector<8x128xf32>
    %44 = arith.addf %34, %43 : vector<8x128xf32>
    %c6 = arith.constant 6 : index
    %c0_23 = arith.constant 0 : index
    %45 = vector.load %arg1[%c6, %c0_23] : memref<12x128xf32, #tpu.memory_space<vmem>>, vector<1x128xf32>
    %c8_i32 = arith.constant 8 : i32
    %46 = tpu.dynamic_rotate %45 by %c8_i32 dim 1 : vector<1x128xf32>, i32 -> vector<1x128xf32>
    %cst_24 = arith.constant 0.000000e+00 : f32
    %47 = vector.broadcast %cst_24 : f32 to vector<1x128xf32>
    %48 = arith.select %3, %46, %47 : vector<1x128xi1>, vector<1x128xf32>
    %c1_25 = arith.constant 1 : index
    %c0_26 = arith.constant 0 : index
    %c0_27 = arith.constant 0 : index
    %49 = vector.load %arg3[%c1_25, %c0_26, %c0_27] : memref<27x8x1xf32, #tpu.memory_space<vmem>>, vector<1x8x1xf32>
    %50 = vector.shape_cast %49 : vector<1x8x1xf32> to vector<8x1xf32>
    %51 = vector.broadcast %50 : vector<8x1xf32> to vector<8x128xf32>
    %52 = vector.broadcast %48 : vector<1x128xf32> to vector<8x128xf32>
    %53 = arith.mulf %51, %52 : vector<8x128xf32>
    %54 = arith.addf %44, %53 : vector<8x128xf32>
    %c0_28 = arith.constant 0 : index
    %c0_29 = arith.constant 0 : index
    %c0_30 = arith.constant 0 : index
    %55 = vector.load %arg3[%c0_28, %c0_29, %c0_30] : memref<27x8x1xf32, #tpu.memory_space<vmem>>, vector<1x8x1xf32>
    %56 = vector.shape_cast %55 : vector<1x8x1xf32> to vector<8x1xf32>
    %57 = vector.broadcast %56 : vector<8x1xf32> to vector<8x128xf32>
    %58 = vector.broadcast %48 : vector<1x128xf32> to vector<8x128xf32>
    %59 = arith.mulf %57, %58 : vector<8x128xf32>
    %60 = arith.addf %11, %59 : vector<8x128xf32>
    %c7 = arith.constant 7 : index
    %c0_31 = arith.constant 0 : index
    %61 = vector.load %arg1[%c7, %c0_31] : memref<12x128xf32, #tpu.memory_space<vmem>>, vector<1x128xf32>
    %c8_i32_32 = arith.constant 8 : i32
    %62 = tpu.dynamic_rotate %61 by %c8_i32_32 dim 1 : vector<1x128xf32>, i32 -> vector<1x128xf32>
    %cst_33 = arith.constant 0.000000e+00 : f32
    %63 = vector.broadcast %cst_33 : f32 to vector<1x128xf32>
    %64 = arith.select %3, %62, %63 : vector<1x128xi1>, vector<1x128xf32>
    %c10_34 = arith.constant 10 : index
    %c0_35 = arith.constant 0 : index
    %c0_36 = arith.constant 0 : index
    %65 = vector.load %arg3[%c10_34, %c0_35, %c0_36] : memref<27x8x1xf32, #tpu.memory_space<vmem>>, vector<1x8x1xf32>
    %66 = vector.shape_cast %65 : vector<1x8x1xf32> to vector<8x1xf32>
    %67 = vector.broadcast %66 : vector<8x1xf32> to vector<8x128xf32>
    %68 = vector.broadcast %64 : vector<1x128xf32> to vector<8x128xf32>
    %69 = arith.mulf %67, %68 : vector<8x128xf32>
    %70 = arith.addf %54, %69 : vector<8x128xf32>
    %c9_37 = arith.constant 9 : index
    %c0_38 = arith.constant 0 : index
    %c0_39 = arith.constant 0 : index
    %71 = vector.load %arg3[%c9_37, %c0_38, %c0_39] : memref<27x8x1xf32, #tpu.memory_space<vmem>>, vector<1x8x1xf32>
    %72 = vector.shape_cast %71 : vector<1x8x1xf32> to vector<8x1xf32>
    %73 = vector.broadcast %72 : vector<8x1xf32> to vector<8x128xf32>
    %74 = vector.broadcast %64 : vector<1x128xf32> to vector<8x128xf32>
    %75 = arith.mulf %73, %74 : vector<8x128xf32>
    %76 = arith.addf %60, %75 : vector<8x128xf32>
    %c8 = arith.constant 8 : index
    %c0_40 = arith.constant 0 : index
    %77 = vector.load %arg1[%c8, %c0_40] : memref<12x128xf32, #tpu.memory_space<vmem>>, vector<1x128xf32>
    %c8_i32_41 = arith.constant 8 : i32
    %78 = tpu.dynamic_rotate %77 by %c8_i32_41 dim 1 : vector<1x128xf32>, i32 -> vector<1x128xf32>
    %cst_42 = arith.constant 0.000000e+00 : f32
    %79 = vector.broadcast %cst_42 : f32 to vector<1x128xf32>
    %80 = arith.select %3, %78, %79 : vector<1x128xi1>, vector<1x128xf32>
    %c19 = arith.constant 19 : index
    %c0_43 = arith.constant 0 : index
    %c0_44 = arith.constant 0 : index
    %81 = vector.load %arg3[%c19, %c0_43, %c0_44] : memref<27x8x1xf32, #tpu.memory_space<vmem>>, vector<1x8x1xf32>
    %82 = vector.shape_cast %81 : vector<1x8x1xf32> to vector<8x1xf32>
    %83 = vector.broadcast %82 : vector<8x1xf32> to vector<8x128xf32>
    %84 = vector.broadcast %80 : vector<1x128xf32> to vector<8x128xf32>
    %85 = arith.mulf %83, %84 : vector<8x128xf32>
    %86 = arith.addf %70, %85 : vector<8x128xf32>
    %c18_45 = arith.constant 18 : index
    %c0_46 = arith.constant 0 : index
    %c0_47 = arith.constant 0 : index
    %87 = vector.load %arg3[%c18_45, %c0_46, %c0_47] : memref<27x8x1xf32, #tpu.memory_space<vmem>>, vector<1x8x1xf32>
    %88 = vector.shape_cast %87 : vector<1x8x1xf32> to vector<8x1xf32>
    %89 = vector.broadcast %88 : vector<8x1xf32> to vector<8x128xf32>
    %90 = vector.broadcast %80 : vector<1x128xf32> to vector<8x128xf32>
    %91 = arith.mulf %89, %90 : vector<8x128xf32>
    %92 = arith.addf %76, %91 : vector<8x128xf32>
    %c9_48 = arith.constant 9 : index
    %c0_49 = arith.constant 0 : index
    %93 = vector.load %arg1[%c9_48, %c0_49] : memref<12x128xf32, #tpu.memory_space<vmem>>, vector<1x128xf32>
    %c8_i32_50 = arith.constant 8 : i32
    %94 = tpu.dynamic_rotate %93 by %c8_i32_50 dim 1 : vector<1x128xf32>, i32 -> vector<1x128xf32>
    %cst_51 = arith.constant 0.000000e+00 : f32
    %95 = vector.broadcast %cst_51 : f32 to vector<1x128xf32>
    %96 = arith.select %3, %94, %95 : vector<1x128xi1>, vector<1x128xf32>
    %c2 = arith.constant 2 : index
    %c0_52 = arith.constant 0 : index
    %c0_53 = arith.constant 0 : index
    %97 = vector.load %arg3[%c2, %c0_52, %c0_53] : memref<27x8x1xf32, #tpu.memory_space<vmem>>, vector<1x8x1xf32>
    %98 = vector.shape_cast %97 : vector<1x8x1xf32> to vector<8x1xf32>
    %99 = vector.broadcast %98 : vector<8x1xf32> to vector<8x128xf32>
    %100 = vector.broadcast %96 : vector<1x128xf32> to vector<8x128xf32>
    %101 = arith.mulf %99, %100 : vector<8x128xf32>
    %102 = arith.addf %86, %101 : vector<8x128xf32>
    %c1_54 = arith.constant 1 : index
    %c0_55 = arith.constant 0 : index
    %c0_56 = arith.constant 0 : index
    %103 = vector.load %arg3[%c1_54, %c0_55, %c0_56] : memref<27x8x1xf32, #tpu.memory_space<vmem>>, vector<1x8x1xf32>
    %104 = vector.shape_cast %103 : vector<1x8x1xf32> to vector<8x1xf32>
    %105 = vector.broadcast %104 : vector<8x1xf32> to vector<8x128xf32>
    %106 = vector.broadcast %96 : vector<1x128xf32> to vector<8x128xf32>
    %107 = arith.mulf %105, %106 : vector<8x128xf32>
    %108 = arith.addf %92, %107 : vector<8x128xf32>
    %c10_57 = arith.constant 10 : index
    %c0_58 = arith.constant 0 : index
    %109 = vector.load %arg1[%c10_57, %c0_58] : memref<12x128xf32, #tpu.memory_space<vmem>>, vector<1x128xf32>
    %c8_i32_59 = arith.constant 8 : i32
    %110 = tpu.dynamic_rotate %109 by %c8_i32_59 dim 1 : vector<1x128xf32>, i32 -> vector<1x128xf32>
    %cst_60 = arith.constant 0.000000e+00 : f32
    %111 = vector.broadcast %cst_60 : f32 to vector<1x128xf32>
    %112 = arith.select %3, %110, %111 : vector<1x128xi1>, vector<1x128xf32>
    %c11_61 = arith.constant 11 : index
    %c0_62 = arith.constant 0 : index
    %c0_63 = arith.constant 0 : index
    %113 = vector.load %arg3[%c11_61, %c0_62, %c0_63] : memref<27x8x1xf32, #tpu.memory_space<vmem>>, vector<1x8x1xf32>
    %114 = vector.shape_cast %113 : vector<1x8x1xf32> to vector<8x1xf32>
    %115 = vector.broadcast %114 : vector<8x1xf32> to vector<8x128xf32>
    %116 = vector.broadcast %112 : vector<1x128xf32> to vector<8x128xf32>
    %117 = arith.mulf %115, %116 : vector<8x128xf32>
    %118 = arith.addf %102, %117 : vector<8x128xf32>
    %c10_64 = arith.constant 10 : index
    %c0_65 = arith.constant 0 : index
    %c0_66 = arith.constant 0 : index
    %119 = vector.load %arg3[%c10_64, %c0_65, %c0_66] : memref<27x8x1xf32, #tpu.memory_space<vmem>>, vector<1x8x1xf32>
    %120 = vector.shape_cast %119 : vector<1x8x1xf32> to vector<8x1xf32>
    %121 = vector.broadcast %120 : vector<8x1xf32> to vector<8x128xf32>
    %122 = vector.broadcast %112 : vector<1x128xf32> to vector<8x128xf32>
    %123 = arith.mulf %121, %122 : vector<8x128xf32>
    %124 = arith.addf %108, %123 : vector<8x128xf32>
    %c11_67 = arith.constant 11 : index
    %c0_68 = arith.constant 0 : index
    %125 = vector.load %arg1[%c11_67, %c0_68] : memref<12x128xf32, #tpu.memory_space<vmem>>, vector<1x128xf32>
    %c8_i32_69 = arith.constant 8 : i32
    %126 = tpu.dynamic_rotate %125 by %c8_i32_69 dim 1 : vector<1x128xf32>, i32 -> vector<1x128xf32>
    %cst_70 = arith.constant 0.000000e+00 : f32
    %127 = vector.broadcast %cst_70 : f32 to vector<1x128xf32>
    %128 = arith.select %3, %126, %127 : vector<1x128xi1>, vector<1x128xf32>
    %c20 = arith.constant 20 : index
    %c0_71 = arith.constant 0 : index
    %c0_72 = arith.constant 0 : index
    %129 = vector.load %arg3[%c20, %c0_71, %c0_72] : memref<27x8x1xf32, #tpu.memory_space<vmem>>, vector<1x8x1xf32>
    %130 = vector.shape_cast %129 : vector<1x8x1xf32> to vector<8x1xf32>
    %131 = vector.broadcast %130 : vector<8x1xf32> to vector<8x128xf32>
    %132 = vector.broadcast %128 : vector<1x128xf32> to vector<8x128xf32>
    %133 = arith.mulf %131, %132 : vector<8x128xf32>
    %134 = arith.addf %118, %133 : vector<8x128xf32>
    %c19_73 = arith.constant 19 : index
    %c0_74 = arith.constant 0 : index
    %c0_75 = arith.constant 0 : index
    %135 = vector.load %arg3[%c19_73, %c0_74, %c0_75] : memref<27x8x1xf32, #tpu.memory_space<vmem>>, vector<1x8x1xf32>
    %136 = vector.shape_cast %135 : vector<1x8x1xf32> to vector<8x1xf32>
    %137 = vector.broadcast %136 : vector<8x1xf32> to vector<8x128xf32>
    %138 = vector.broadcast %128 : vector<1x128xf32> to vector<8x128xf32>
    %139 = arith.mulf %137, %138 : vector<8x128xf32>
    %140 = arith.addf %124, %139 : vector<8x128xf32>
    %141 = arith.andi %3, %9 : vector<1x128xi1>
    %c6_76 = arith.constant 6 : index
    %c0_77 = arith.constant 0 : index
    %142 = vector.load %arg1[%c6_76, %c0_77] : memref<12x128xf32, #tpu.memory_space<vmem>>, vector<1x128xf32>
    %c7_i32 = arith.constant 7 : i32
    %143 = tpu.dynamic_rotate %142 by %c7_i32 dim 1 : vector<1x128xf32>, i32 -> vector<1x128xf32>
    %cst_78 = arith.constant 0.000000e+00 : f32
    %144 = vector.broadcast %cst_78 : f32 to vector<1x128xf32>
    %145 = arith.select %141, %143, %144 : vector<1x128xi1>, vector<1x128xf32>
    %c2_79 = arith.constant 2 : index
    %c0_80 = arith.constant 0 : index
    %c0_81 = arith.constant 0 : index
    %146 = vector.load %arg3[%c2_79, %c0_80, %c0_81] : memref<27x8x1xf32, #tpu.memory_space<vmem>>, vector<1x8x1xf32>
    %147 = vector.shape_cast %146 : vector<1x8x1xf32> to vector<8x1xf32>
    %148 = vector.broadcast %147 : vector<8x1xf32> to vector<8x128xf32>
    %149 = vector.broadcast %145 : vector<1x128xf32> to vector<8x128xf32>
    %150 = arith.mulf %148, %149 : vector<8x128xf32>
    %151 = arith.addf %140, %150 : vector<8x128xf32>
    %c7_82 = arith.constant 7 : index
    %c0_83 = arith.constant 0 : index
    %152 = vector.load %arg1[%c7_82, %c0_83] : memref<12x128xf32, #tpu.memory_space<vmem>>, vector<1x128xf32>
    %c7_i32_84 = arith.constant 7 : i32
    %153 = tpu.dynamic_rotate %152 by %c7_i32_84 dim 1 : vector<1x128xf32>, i32 -> vector<1x128xf32>
    %cst_85 = arith.constant 0.000000e+00 : f32
    %154 = vector.broadcast %cst_85 : f32 to vector<1x128xf32>
    %155 = arith.select %141, %153, %154 : vector<1x128xi1>, vector<1x128xf32>
    %c11_86 = arith.constant 11 : index
    %c0_87 = arith.constant 0 : index
    %c0_88 = arith.constant 0 : index
    %156 = vector.load %arg3[%c11_86, %c0_87, %c0_88] : memref<27x8x1xf32, #tpu.memory_space<vmem>>, vector<1x8x1xf32>
    %157 = vector.shape_cast %156 : vector<1x8x1xf32> to vector<8x1xf32>
    %158 = vector.broadcast %157 : vector<8x1xf32> to vector<8x128xf32>
    %159 = vector.broadcast %155 : vector<1x128xf32> to vector<8x128xf32>
    %160 = arith.mulf %158, %159 : vector<8x128xf32>
    %161 = arith.addf %151, %160 : vector<8x128xf32>
    %c8_89 = arith.constant 8 : index
    %c0_90 = arith.constant 0 : index
    %162 = vector.load %arg1[%c8_89, %c0_90] : memref<12x128xf32, #tpu.memory_space<vmem>>, vector<1x128xf32>
    %c7_i32_91 = arith.constant 7 : i32
    %163 = tpu.dynamic_rotate %162 by %c7_i32_91 dim 1 : vector<1x128xf32>, i32 -> vector<1x128xf32>
    %cst_92 = arith.constant 0.000000e+00 : f32
    %164 = vector.broadcast %cst_92 : f32 to vector<1x128xf32>
    %165 = arith.select %141, %163, %164 : vector<1x128xi1>, vector<1x128xf32>
    %c20_93 = arith.constant 20 : index
    %c0_94 = arith.constant 0 : index
    %c0_95 = arith.constant 0 : index
    %166 = vector.load %arg3[%c20_93, %c0_94, %c0_95] : memref<27x8x1xf32, #tpu.memory_space<vmem>>, vector<1x8x1xf32>
    %167 = vector.shape_cast %166 : vector<1x8x1xf32> to vector<8x1xf32>
    %168 = vector.broadcast %167 : vector<8x1xf32> to vector<8x128xf32>
    %169 = vector.broadcast %165 : vector<1x128xf32> to vector<8x128xf32>
    %170 = arith.mulf %168, %169 : vector<8x128xf32>
    %171 = arith.addf %161, %170 : vector<8x128xf32>
    %c3 = arith.constant 3 : index
    %c0_96 = arith.constant 0 : index
    %172 = vector.load %arg1[%c3, %c0_96] : memref<12x128xf32, #tpu.memory_space<vmem>>, vector<1x128xf32>
    %c1_i32_97 = arith.constant 1 : i32
    %173 = tpu.dynamic_rotate %172 by %c1_i32_97 dim 1 : vector<1x128xf32>, i32 -> vector<1x128xf32>
    %cst_98 = arith.constant 0.000000e+00 : f32
    %174 = vector.broadcast %cst_98 : f32 to vector<1x128xf32>
    %175 = arith.select %7, %173, %174 : vector<1x128xi1>, vector<1x128xf32>
    %c3_99 = arith.constant 3 : index
    %c0_100 = arith.constant 0 : index
    %c0_101 = arith.constant 0 : index
    %176 = vector.load %arg3[%c3_99, %c0_100, %c0_101] : memref<27x8x1xf32, #tpu.memory_space<vmem>>, vector<1x8x1xf32>
    %177 = vector.shape_cast %176 : vector<1x8x1xf32> to vector<8x1xf32>
    %178 = vector.broadcast %177 : vector<8x1xf32> to vector<8x128xf32>
    %179 = vector.broadcast %175 : vector<1x128xf32> to vector<8x128xf32>
    %180 = arith.mulf %178, %179 : vector<8x128xf32>
    %181 = arith.addf %134, %180 : vector<8x128xf32>
    %c0_102 = arith.constant 0 : index
    %c0_103 = arith.constant 0 : index
    %c0_104 = arith.constant 0 : index
    %182 = vector.load %arg3[%c0_102, %c0_103, %c0_104] : memref<27x8x1xf32, #tpu.memory_space<vmem>>, vector<1x8x1xf32>
    %183 = vector.shape_cast %182 : vector<1x8x1xf32> to vector<8x1xf32>
    %184 = vector.broadcast %183 : vector<8x1xf32> to vector<8x128xf32>
    %185 = vector.broadcast %175 : vector<1x128xf32> to vector<8x128xf32>
    %186 = arith.mulf %184, %185 : vector<8x128xf32>
    %187 = arith.addf %12, %186 : vector<8x128xf32>
    %c4 = arith.constant 4 : index
    %c0_105 = arith.constant 0 : index
    %188 = vector.load %arg1[%c4, %c0_105] : memref<12x128xf32, #tpu.memory_space<vmem>>, vector<1x128xf32>
    %c1_i32_106 = arith.constant 1 : i32
    %189 = tpu.dynamic_rotate %188 by %c1_i32_106 dim 1 : vector<1x128xf32>, i32 -> vector<1x128xf32>
    %cst_107 = arith.constant 0.000000e+00 : f32
    %190 = vector.broadcast %cst_107 : f32 to vector<1x128xf32>
    %191 = arith.select %7, %189, %190 : vector<1x128xi1>, vector<1x128xf32>
    %c12 = arith.constant 12 : index
    %c0_108 = arith.constant 0 : index
    %c0_109 = arith.constant 0 : index
    %192 = vector.load %arg3[%c12, %c0_108, %c0_109] : memref<27x8x1xf32, #tpu.memory_space<vmem>>, vector<1x8x1xf32>
    %193 = vector.shape_cast %192 : vector<1x8x1xf32> to vector<8x1xf32>
    %194 = vector.broadcast %193 : vector<8x1xf32> to vector<8x128xf32>
    %195 = vector.broadcast %191 : vector<1x128xf32> to vector<8x128xf32>
    %196 = arith.mulf %194, %195 : vector<8x128xf32>
    %197 = arith.addf %181, %196 : vector<8x128xf32>
    %c9_110 = arith.constant 9 : index
    %c0_111 = arith.constant 0 : index
    %c0_112 = arith.constant 0 : index
    %198 = vector.load %arg3[%c9_110, %c0_111, %c0_112] : memref<27x8x1xf32, #tpu.memory_space<vmem>>, vector<1x8x1xf32>
    %199 = vector.shape_cast %198 : vector<1x8x1xf32> to vector<8x1xf32>
    %200 = vector.broadcast %199 : vector<8x1xf32> to vector<8x128xf32>
    %201 = vector.broadcast %191 : vector<1x128xf32> to vector<8x128xf32>
    %202 = arith.mulf %200, %201 : vector<8x128xf32>
    %203 = arith.addf %187, %202 : vector<8x128xf32>
    %c5 = arith.constant 5 : index
    %c0_113 = arith.constant 0 : index
    %204 = vector.load %arg1[%c5, %c0_113] : memref<12x128xf32, #tpu.memory_space<vmem>>, vector<1x128xf32>
    %c1_i32_114 = arith.constant 1 : i32
    %205 = tpu.dynamic_rotate %204 by %c1_i32_114 dim 1 : vector<1x128xf32>, i32 -> vector<1x128xf32>
    %cst_115 = arith.constant 0.000000e+00 : f32
    %206 = vector.broadcast %cst_115 : f32 to vector<1x128xf32>
    %207 = arith.select %7, %205, %206 : vector<1x128xi1>, vector<1x128xf32>
    %c21 = arith.constant 21 : index
    %c0_116 = arith.constant 0 : index
    %c0_117 = arith.constant 0 : index
    %208 = vector.load %arg3[%c21, %c0_116, %c0_117] : memref<27x8x1xf32, #tpu.memory_space<vmem>>, vector<1x8x1xf32>
    %209 = vector.shape_cast %208 : vector<1x8x1xf32> to vector<8x1xf32>
    %210 = vector.broadcast %209 : vector<8x1xf32> to vector<8x128xf32>
    %211 = vector.broadcast %207 : vector<1x128xf32> to vector<8x128xf32>
    %212 = arith.mulf %210, %211 : vector<8x128xf32>
    %213 = arith.addf %197, %212 : vector<8x128xf32>
    %c18_118 = arith.constant 18 : index
    %c0_119 = arith.constant 0 : index
    %c0_120 = arith.constant 0 : index
    %214 = vector.load %arg3[%c18_118, %c0_119, %c0_120] : memref<27x8x1xf32, #tpu.memory_space<vmem>>, vector<1x8x1xf32>
    %215 = vector.shape_cast %214 : vector<1x8x1xf32> to vector<8x1xf32>
    %216 = vector.broadcast %215 : vector<8x1xf32> to vector<8x128xf32>
    %217 = vector.broadcast %207 : vector<1x128xf32> to vector<8x128xf32>
    %218 = arith.mulf %216, %217 : vector<8x128xf32>
    %219 = arith.addf %203, %218 : vector<8x128xf32>
    %c0_121 = arith.constant 0 : index
    %c0_122 = arith.constant 0 : index
    %220 = vector.load %arg1[%c0_121, %c0_122] : memref<12x128xf32, #tpu.memory_space<vmem>>, vector<1x128xf32>
    %c4_123 = arith.constant 4 : index
    %c0_124 = arith.constant 0 : index
    %c0_125 = arith.constant 0 : index
    %221 = vector.load %arg3[%c4_123, %c0_124, %c0_125] : memref<27x8x1xf32, #tpu.memory_space<vmem>>, vector<1x8x1xf32>
    %222 = vector.shape_cast %221 : vector<1x8x1xf32> to vector<8x1xf32>
    %223 = vector.broadcast %222 : vector<8x1xf32> to vector<8x128xf32>
    %224 = vector.broadcast %220 : vector<1x128xf32> to vector<8x128xf32>
    %225 = arith.mulf %223, %224 : vector<8x128xf32>
    %226 = arith.addf %213, %225 : vector<8x128xf32>
    %c3_126 = arith.constant 3 : index
    %c0_127 = arith.constant 0 : index
    %c0_128 = arith.constant 0 : index
    %227 = vector.load %arg3[%c3_126, %c0_127, %c0_128] : memref<27x8x1xf32, #tpu.memory_space<vmem>>, vector<1x8x1xf32>
    %228 = vector.shape_cast %227 : vector<1x8x1xf32> to vector<8x1xf32>
    %229 = vector.broadcast %228 : vector<8x1xf32> to vector<8x128xf32>
    %230 = vector.broadcast %220 : vector<1x128xf32> to vector<8x128xf32>
    %231 = arith.mulf %229, %230 : vector<8x128xf32>
    %232 = arith.addf %171, %231 : vector<8x128xf32>
    %c1_129 = arith.constant 1 : index
    %c0_130 = arith.constant 0 : index
    %c0_131 = arith.constant 0 : index
    %233 = vector.load %arg3[%c1_129, %c0_130, %c0_131] : memref<27x8x1xf32, #tpu.memory_space<vmem>>, vector<1x8x1xf32>
    %234 = vector.shape_cast %233 : vector<1x8x1xf32> to vector<8x1xf32>
    %235 = vector.broadcast %234 : vector<8x1xf32> to vector<8x128xf32>
    %236 = vector.broadcast %220 : vector<1x128xf32> to vector<8x128xf32>
    %237 = arith.mulf %235, %236 : vector<8x128xf32>
    %238 = arith.addf %219, %237 : vector<8x128xf32>
    %c0_132 = arith.constant 0 : index
    %c0_133 = arith.constant 0 : index
    %c0_134 = arith.constant 0 : index
    %239 = vector.load %arg3[%c0_132, %c0_133, %c0_134] : memref<27x8x1xf32, #tpu.memory_space<vmem>>, vector<1x8x1xf32>
    %240 = vector.shape_cast %239 : vector<1x8x1xf32> to vector<8x1xf32>
    %241 = vector.broadcast %240 : vector<8x1xf32> to vector<8x128xf32>
    %242 = vector.broadcast %220 : vector<1x128xf32> to vector<8x128xf32>
    %243 = arith.mulf %241, %242 : vector<8x128xf32>
    %244 = arith.addf %13, %243 : vector<8x128xf32>
    %c1_135 = arith.constant 1 : index
    %c0_136 = arith.constant 0 : index
    %245 = vector.load %arg1[%c1_135, %c0_136] : memref<12x128xf32, #tpu.memory_space<vmem>>, vector<1x128xf32>
    %c13 = arith.constant 13 : index
    %c0_137 = arith.constant 0 : index
    %c0_138 = arith.constant 0 : index
    %246 = vector.load %arg3[%c13, %c0_137, %c0_138] : memref<27x8x1xf32, #tpu.memory_space<vmem>>, vector<1x8x1xf32>
    %247 = vector.shape_cast %246 : vector<1x8x1xf32> to vector<8x1xf32>
    %248 = vector.broadcast %247 : vector<8x1xf32> to vector<8x128xf32>
    %249 = vector.broadcast %245 : vector<1x128xf32> to vector<8x128xf32>
    %250 = arith.mulf %248, %249 : vector<8x128xf32>
    %251 = arith.addf %226, %250 : vector<8x128xf32>
    %c12_139 = arith.constant 12 : index
    %c0_140 = arith.constant 0 : index
    %c0_141 = arith.constant 0 : index
    %252 = vector.load %arg3[%c12_139, %c0_140, %c0_141] : memref<27x8x1xf32, #tpu.memory_space<vmem>>, vector<1x8x1xf32>
    %253 = vector.shape_cast %252 : vector<1x8x1xf32> to vector<8x1xf32>
    %254 = vector.broadcast %253 : vector<8x1xf32> to vector<8x128xf32>
    %255 = vector.broadcast %245 : vector<1x128xf32> to vector<8x128xf32>
    %256 = arith.mulf %254, %255 : vector<8x128xf32>
    %257 = arith.addf %232, %256 : vector<8x128xf32>
    %c10_142 = arith.constant 10 : index
    %c0_143 = arith.constant 0 : index
    %c0_144 = arith.constant 0 : index
    %258 = vector.load %arg3[%c10_142, %c0_143, %c0_144] : memref<27x8x1xf32, #tpu.memory_space<vmem>>, vector<1x8x1xf32>
    %259 = vector.shape_cast %258 : vector<1x8x1xf32> to vector<8x1xf32>
    %260 = vector.broadcast %259 : vector<8x1xf32> to vector<8x128xf32>
    %261 = vector.broadcast %245 : vector<1x128xf32> to vector<8x128xf32>
    %262 = arith.mulf %260, %261 : vector<8x128xf32>
    %263 = arith.addf %238, %262 : vector<8x128xf32>
    %c9_145 = arith.constant 9 : index
    %c0_146 = arith.constant 0 : index
    %c0_147 = arith.constant 0 : index
    %264 = vector.load %arg3[%c9_145, %c0_146, %c0_147] : memref<27x8x1xf32, #tpu.memory_space<vmem>>, vector<1x8x1xf32>
    %265 = vector.shape_cast %264 : vector<1x8x1xf32> to vector<8x1xf32>
    %266 = vector.broadcast %265 : vector<8x1xf32> to vector<8x128xf32>
    %267 = vector.broadcast %245 : vector<1x128xf32> to vector<8x128xf32>
    %268 = arith.mulf %266, %267 : vector<8x128xf32>
    %269 = arith.addf %244, %268 : vector<8x128xf32>
    %c2_148 = arith.constant 2 : index
    %c0_149 = arith.constant 0 : index
    %270 = vector.load %arg1[%c2_148, %c0_149] : memref<12x128xf32, #tpu.memory_space<vmem>>, vector<1x128xf32>
    %c22 = arith.constant 22 : index
    %c0_150 = arith.constant 0 : index
    %c0_151 = arith.constant 0 : index
    %271 = vector.load %arg3[%c22, %c0_150, %c0_151] : memref<27x8x1xf32, #tpu.memory_space<vmem>>, vector<1x8x1xf32>
    %272 = vector.shape_cast %271 : vector<1x8x1xf32> to vector<8x1xf32>
    %273 = vector.broadcast %272 : vector<8x1xf32> to vector<8x128xf32>
    %274 = vector.broadcast %270 : vector<1x128xf32> to vector<8x128xf32>
    %275 = arith.mulf %273, %274 : vector<8x128xf32>
    %276 = arith.addf %251, %275 : vector<8x128xf32>
    %c21_152 = arith.constant 21 : index
    %c0_153 = arith.constant 0 : index
    %c0_154 = arith.constant 0 : index
    %277 = vector.load %arg3[%c21_152, %c0_153, %c0_154] : memref<27x8x1xf32, #tpu.memory_space<vmem>>, vector<1x8x1xf32>
    %278 = vector.shape_cast %277 : vector<1x8x1xf32> to vector<8x1xf32>
    %279 = vector.broadcast %278 : vector<8x1xf32> to vector<8x128xf32>
    %280 = vector.broadcast %270 : vector<1x128xf32> to vector<8x128xf32>
    %281 = arith.mulf %279, %280 : vector<8x128xf32>
    %282 = arith.addf %257, %281 : vector<8x128xf32>
    %c19_155 = arith.constant 19 : index
    %c0_156 = arith.constant 0 : index
    %c0_157 = arith.constant 0 : index
    %283 = vector.load %arg3[%c19_155, %c0_156, %c0_157] : memref<27x8x1xf32, #tpu.memory_space<vmem>>, vector<1x8x1xf32>
    %284 = vector.shape_cast %283 : vector<1x8x1xf32> to vector<8x1xf32>
    %285 = vector.broadcast %284 : vector<8x1xf32> to vector<8x128xf32>
    %286 = vector.broadcast %270 : vector<1x128xf32> to vector<8x128xf32>
    %287 = arith.mulf %285, %286 : vector<8x128xf32>
    %288 = arith.addf %263, %287 : vector<8x128xf32>
    %c18_158 = arith.constant 18 : index
    %c0_159 = arith.constant 0 : index
    %c0_160 = arith.constant 0 : index
    %289 = vector.load %arg3[%c18_158, %c0_159, %c0_160] : memref<27x8x1xf32, #tpu.memory_space<vmem>>, vector<1x8x1xf32>
    %290 = vector.shape_cast %289 : vector<1x8x1xf32> to vector<8x1xf32>
    %291 = vector.broadcast %290 : vector<8x1xf32> to vector<8x128xf32>
    %292 = vector.broadcast %270 : vector<1x128xf32> to vector<8x128xf32>
    %293 = arith.mulf %291, %292 : vector<8x128xf32>
    %294 = arith.addf %269, %293 : vector<8x128xf32>
    %c3_161 = arith.constant 3 : index
    %c0_162 = arith.constant 0 : index
    %295 = vector.load %arg1[%c3_161, %c0_162] : memref<12x128xf32, #tpu.memory_space<vmem>>, vector<1x128xf32>
    %c5_163 = arith.constant 5 : index
    %c0_164 = arith.constant 0 : index
    %c0_165 = arith.constant 0 : index
    %296 = vector.load %arg3[%c5_163, %c0_164, %c0_165] : memref<27x8x1xf32, #tpu.memory_space<vmem>>, vector<1x8x1xf32>
    %297 = vector.shape_cast %296 : vector<1x8x1xf32> to vector<8x1xf32>
    %298 = vector.broadcast %297 : vector<8x1xf32> to vector<8x128xf32>
    %299 = vector.broadcast %295 : vector<1x128xf32> to vector<8x128xf32>
    %300 = arith.mulf %298, %299 : vector<8x128xf32>
    %301 = arith.addf %276, %300 : vector<8x128xf32>
    %c4_166 = arith.constant 4 : index
    %c0_167 = arith.constant 0 : index
    %c0_168 = arith.constant 0 : index
    %302 = vector.load %arg3[%c4_166, %c0_167, %c0_168] : memref<27x8x1xf32, #tpu.memory_space<vmem>>, vector<1x8x1xf32>
    %303 = vector.shape_cast %302 : vector<1x8x1xf32> to vector<8x1xf32>
    %304 = vector.broadcast %303 : vector<8x1xf32> to vector<8x128xf32>
    %305 = vector.broadcast %295 : vector<1x128xf32> to vector<8x128xf32>
    %306 = arith.mulf %304, %305 : vector<8x128xf32>
    %307 = arith.addf %282, %306 : vector<8x128xf32>
    %c2_169 = arith.constant 2 : index
    %c0_170 = arith.constant 0 : index
    %c0_171 = arith.constant 0 : index
    %308 = vector.load %arg3[%c2_169, %c0_170, %c0_171] : memref<27x8x1xf32, #tpu.memory_space<vmem>>, vector<1x8x1xf32>
    %309 = vector.shape_cast %308 : vector<1x8x1xf32> to vector<8x1xf32>
    %310 = vector.broadcast %309 : vector<8x1xf32> to vector<8x128xf32>
    %311 = vector.broadcast %295 : vector<1x128xf32> to vector<8x128xf32>
    %312 = arith.mulf %310, %311 : vector<8x128xf32>
    %313 = arith.addf %288, %312 : vector<8x128xf32>
    %c1_172 = arith.constant 1 : index
    %c0_173 = arith.constant 0 : index
    %c0_174 = arith.constant 0 : index
    %314 = vector.load %arg3[%c1_172, %c0_173, %c0_174] : memref<27x8x1xf32, #tpu.memory_space<vmem>>, vector<1x8x1xf32>
    %315 = vector.shape_cast %314 : vector<1x8x1xf32> to vector<8x1xf32>
    %316 = vector.broadcast %315 : vector<8x1xf32> to vector<8x128xf32>
    %317 = vector.broadcast %295 : vector<1x128xf32> to vector<8x128xf32>
    %318 = arith.mulf %316, %317 : vector<8x128xf32>
    %319 = arith.addf %294, %318 : vector<8x128xf32>
    %c4_175 = arith.constant 4 : index
    %c0_176 = arith.constant 0 : index
    %320 = vector.load %arg1[%c4_175, %c0_176] : memref<12x128xf32, #tpu.memory_space<vmem>>, vector<1x128xf32>
    %c14 = arith.constant 14 : index
    %c0_177 = arith.constant 0 : index
    %c0_178 = arith.constant 0 : index
    %321 = vector.load %arg3[%c14, %c0_177, %c0_178] : memref<27x8x1xf32, #tpu.memory_space<vmem>>, vector<1x8x1xf32>
    %322 = vector.shape_cast %321 : vector<1x8x1xf32> to vector<8x1xf32>
    %323 = vector.broadcast %322 : vector<8x1xf32> to vector<8x128xf32>
    %324 = vector.broadcast %320 : vector<1x128xf32> to vector<8x128xf32>
    %325 = arith.mulf %323, %324 : vector<8x128xf32>
    %326 = arith.addf %301, %325 : vector<8x128xf32>
    %c13_179 = arith.constant 13 : index
    %c0_180 = arith.constant 0 : index
    %c0_181 = arith.constant 0 : index
    %327 = vector.load %arg3[%c13_179, %c0_180, %c0_181] : memref<27x8x1xf32, #tpu.memory_space<vmem>>, vector<1x8x1xf32>
    %328 = vector.shape_cast %327 : vector<1x8x1xf32> to vector<8x1xf32>
    %329 = vector.broadcast %328 : vector<8x1xf32> to vector<8x128xf32>
    %330 = vector.broadcast %320 : vector<1x128xf32> to vector<8x128xf32>
    %331 = arith.mulf %329, %330 : vector<8x128xf32>
    %332 = arith.addf %307, %331 : vector<8x128xf32>
    %c11_182 = arith.constant 11 : index
    %c0_183 = arith.constant 0 : index
    %c0_184 = arith.constant 0 : index
    %333 = vector.load %arg3[%c11_182, %c0_183, %c0_184] : memref<27x8x1xf32, #tpu.memory_space<vmem>>, vector<1x8x1xf32>
    %334 = vector.shape_cast %333 : vector<1x8x1xf32> to vector<8x1xf32>
    %335 = vector.broadcast %334 : vector<8x1xf32> to vector<8x128xf32>
    %336 = vector.broadcast %320 : vector<1x128xf32> to vector<8x128xf32>
    %337 = arith.mulf %335, %336 : vector<8x128xf32>
    %338 = arith.addf %313, %337 : vector<8x128xf32>
    %c10_185 = arith.constant 10 : index
    %c0_186 = arith.constant 0 : index
    %c0_187 = arith.constant 0 : index
    %339 = vector.load %arg3[%c10_185, %c0_186, %c0_187] : memref<27x8x1xf32, #tpu.memory_space<vmem>>, vector<1x8x1xf32>
    %340 = vector.shape_cast %339 : vector<1x8x1xf32> to vector<8x1xf32>
    %341 = vector.broadcast %340 : vector<8x1xf32> to vector<8x128xf32>
    %342 = vector.broadcast %320 : vector<1x128xf32> to vector<8x128xf32>
    %343 = arith.mulf %341, %342 : vector<8x128xf32>
    %344 = arith.addf %319, %343 : vector<8x128xf32>
    %c5_188 = arith.constant 5 : index
    %c0_189 = arith.constant 0 : index
    %345 = vector.load %arg1[%c5_188, %c0_189] : memref<12x128xf32, #tpu.memory_space<vmem>>, vector<1x128xf32>
    %c23 = arith.constant 23 : index
    %c0_190 = arith.constant 0 : index
    %c0_191 = arith.constant 0 : index
    %346 = vector.load %arg3[%c23, %c0_190, %c0_191] : memref<27x8x1xf32, #tpu.memory_space<vmem>>, vector<1x8x1xf32>
    %347 = vector.shape_cast %346 : vector<1x8x1xf32> to vector<8x1xf32>
    %348 = vector.broadcast %347 : vector<8x1xf32> to vector<8x128xf32>
    %349 = vector.broadcast %345 : vector<1x128xf32> to vector<8x128xf32>
    %350 = arith.mulf %348, %349 : vector<8x128xf32>
    %351 = arith.addf %326, %350 : vector<8x128xf32>
    %c22_192 = arith.constant 22 : index
    %c0_193 = arith.constant 0 : index
    %c0_194 = arith.constant 0 : index
    %352 = vector.load %arg3[%c22_192, %c0_193, %c0_194] : memref<27x8x1xf32, #tpu.memory_space<vmem>>, vector<1x8x1xf32>
    %353 = vector.shape_cast %352 : vector<1x8x1xf32> to vector<8x1xf32>
    %354 = vector.broadcast %353 : vector<8x1xf32> to vector<8x128xf32>
    %355 = vector.broadcast %345 : vector<1x128xf32> to vector<8x128xf32>
    %356 = arith.mulf %354, %355 : vector<8x128xf32>
    %357 = arith.addf %332, %356 : vector<8x128xf32>
    %c20_195 = arith.constant 20 : index
    %c0_196 = arith.constant 0 : index
    %c0_197 = arith.constant 0 : index
    %358 = vector.load %arg3[%c20_195, %c0_196, %c0_197] : memref<27x8x1xf32, #tpu.memory_space<vmem>>, vector<1x8x1xf32>
    %359 = vector.shape_cast %358 : vector<1x8x1xf32> to vector<8x1xf32>
    %360 = vector.broadcast %359 : vector<8x1xf32> to vector<8x128xf32>
    %361 = vector.broadcast %345 : vector<1x128xf32> to vector<8x128xf32>
    %362 = arith.mulf %360, %361 : vector<8x128xf32>
    %363 = arith.addf %338, %362 : vector<8x128xf32>
    %c19_198 = arith.constant 19 : index
    %c0_199 = arith.constant 0 : index
    %c0_200 = arith.constant 0 : index
    %364 = vector.load %arg3[%c19_198, %c0_199, %c0_200] : memref<27x8x1xf32, #tpu.memory_space<vmem>>, vector<1x8x1xf32>
    %365 = vector.shape_cast %364 : vector<1x8x1xf32> to vector<8x1xf32>
    %366 = vector.broadcast %365 : vector<8x1xf32> to vector<8x128xf32>
    %367 = vector.broadcast %345 : vector<1x128xf32> to vector<8x128xf32>
    %368 = arith.mulf %366, %367 : vector<8x128xf32>
    %369 = arith.addf %344, %368 : vector<8x128xf32>
    %c0_201 = arith.constant 0 : index
    %c0_202 = arith.constant 0 : index
    %370 = vector.load %arg1[%c0_201, %c0_202] : memref<12x128xf32, #tpu.memory_space<vmem>>, vector<1x128xf32>
    %c127_i32 = arith.constant 127 : i32
    %371 = tpu.dynamic_rotate %370 by %c127_i32 dim 1 : vector<1x128xf32>, i32 -> vector<1x128xf32>
    %cst_203 = arith.constant 0.000000e+00 : f32
    %372 = vector.broadcast %cst_203 : f32 to vector<1x128xf32>
    %373 = arith.select %9, %371, %372 : vector<1x128xi1>, vector<1x128xf32>
    %c5_204 = arith.constant 5 : index
    %c0_205 = arith.constant 0 : index
    %c0_206 = arith.constant 0 : index
    %374 = vector.load %arg3[%c5_204, %c0_205, %c0_206] : memref<27x8x1xf32, #tpu.memory_space<vmem>>, vector<1x8x1xf32>
    %375 = vector.shape_cast %374 : vector<1x8x1xf32> to vector<8x1xf32>
    %376 = vector.broadcast %375 : vector<8x1xf32> to vector<8x128xf32>
    %377 = vector.broadcast %373 : vector<1x128xf32> to vector<8x128xf32>
    %378 = arith.mulf %376, %377 : vector<8x128xf32>
    %379 = arith.addf %357, %378 : vector<8x128xf32>
    %c2_207 = arith.constant 2 : index
    %c0_208 = arith.constant 0 : index
    %c0_209 = arith.constant 0 : index
    %380 = vector.load %arg3[%c2_207, %c0_208, %c0_209] : memref<27x8x1xf32, #tpu.memory_space<vmem>>, vector<1x8x1xf32>
    %381 = vector.shape_cast %380 : vector<1x8x1xf32> to vector<8x1xf32>
    %382 = vector.broadcast %381 : vector<8x1xf32> to vector<8x128xf32>
    %383 = vector.broadcast %373 : vector<1x128xf32> to vector<8x128xf32>
    %384 = arith.mulf %382, %383 : vector<8x128xf32>
    %385 = arith.addf %369, %384 : vector<8x128xf32>
    %c1_210 = arith.constant 1 : index
    %c0_211 = arith.constant 0 : index
    %386 = vector.load %arg1[%c1_210, %c0_211] : memref<12x128xf32, #tpu.memory_space<vmem>>, vector<1x128xf32>
    %c127_i32_212 = arith.constant 127 : i32
    %387 = tpu.dynamic_rotate %386 by %c127_i32_212 dim 1 : vector<1x128xf32>, i32 -> vector<1x128xf32>
    %cst_213 = arith.constant 0.000000e+00 : f32
    %388 = vector.broadcast %cst_213 : f32 to vector<1x128xf32>
    %389 = arith.select %9, %387, %388 : vector<1x128xi1>, vector<1x128xf32>
    %c14_214 = arith.constant 14 : index
    %c0_215 = arith.constant 0 : index
    %c0_216 = arith.constant 0 : index
    %390 = vector.load %arg3[%c14_214, %c0_215, %c0_216] : memref<27x8x1xf32, #tpu.memory_space<vmem>>, vector<1x8x1xf32>
    %391 = vector.shape_cast %390 : vector<1x8x1xf32> to vector<8x1xf32>
    %392 = vector.broadcast %391 : vector<8x1xf32> to vector<8x128xf32>
    %393 = vector.broadcast %389 : vector<1x128xf32> to vector<8x128xf32>
    %394 = arith.mulf %392, %393 : vector<8x128xf32>
    %395 = arith.addf %379, %394 : vector<8x128xf32>
    %c11_217 = arith.constant 11 : index
    %c0_218 = arith.constant 0 : index
    %c0_219 = arith.constant 0 : index
    %396 = vector.load %arg3[%c11_217, %c0_218, %c0_219] : memref<27x8x1xf32, #tpu.memory_space<vmem>>, vector<1x8x1xf32>
    %397 = vector.shape_cast %396 : vector<1x8x1xf32> to vector<8x1xf32>
    %398 = vector.broadcast %397 : vector<8x1xf32> to vector<8x128xf32>
    %399 = vector.broadcast %389 : vector<1x128xf32> to vector<8x128xf32>
    %400 = arith.mulf %398, %399 : vector<8x128xf32>
    %401 = arith.addf %385, %400 : vector<8x128xf32>
    %c2_220 = arith.constant 2 : index
    %c0_221 = arith.constant 0 : index
    %402 = vector.load %arg1[%c2_220, %c0_221] : memref<12x128xf32, #tpu.memory_space<vmem>>, vector<1x128xf32>
    %c127_i32_222 = arith.constant 127 : i32
    %403 = tpu.dynamic_rotate %402 by %c127_i32_222 dim 1 : vector<1x128xf32>, i32 -> vector<1x128xf32>
    %cst_223 = arith.constant 0.000000e+00 : f32
    %404 = vector.broadcast %cst_223 : f32 to vector<1x128xf32>
    %405 = arith.select %9, %403, %404 : vector<1x128xi1>, vector<1x128xf32>
    %c23_224 = arith.constant 23 : index
    %c0_225 = arith.constant 0 : index
    %c0_226 = arith.constant 0 : index
    %406 = vector.load %arg3[%c23_224, %c0_225, %c0_226] : memref<27x8x1xf32, #tpu.memory_space<vmem>>, vector<1x8x1xf32>
    %407 = vector.shape_cast %406 : vector<1x8x1xf32> to vector<8x1xf32>
    %408 = vector.broadcast %407 : vector<8x1xf32> to vector<8x128xf32>
    %409 = vector.broadcast %405 : vector<1x128xf32> to vector<8x128xf32>
    %410 = arith.mulf %408, %409 : vector<8x128xf32>
    %411 = arith.addf %395, %410 : vector<8x128xf32>
    %c20_227 = arith.constant 20 : index
    %c0_228 = arith.constant 0 : index
    %c0_229 = arith.constant 0 : index
    %412 = vector.load %arg3[%c20_227, %c0_228, %c0_229] : memref<27x8x1xf32, #tpu.memory_space<vmem>>, vector<1x8x1xf32>
    %413 = vector.shape_cast %412 : vector<1x8x1xf32> to vector<8x1xf32>
    %414 = vector.broadcast %413 : vector<8x1xf32> to vector<8x128xf32>
    %415 = vector.broadcast %405 : vector<1x128xf32> to vector<8x128xf32>
    %416 = arith.mulf %414, %415 : vector<8x128xf32>
    %417 = arith.addf %401, %416 : vector<8x128xf32>
    %c9_230 = arith.constant 9 : index
    %c0_231 = arith.constant 0 : index
    %418 = vector.load %arg1[%c9_230, %c0_231] : memref<12x128xf32, #tpu.memory_space<vmem>>, vector<1x128xf32>
    %c1_i32_232 = arith.constant 1 : i32
    %419 = tpu.dynamic_rotate %418 by %c1_i32_232 dim 1 : vector<1x128xf32>, i32 -> vector<1x128xf32>
    %cst_233 = arith.constant 0.000000e+00 : f32
    %420 = vector.broadcast %cst_233 : f32 to vector<1x128xf32>
    %421 = arith.select %7, %419, %420 : vector<1x128xi1>, vector<1x128xf32>
    %c6_234 = arith.constant 6 : index
    %c0_235 = arith.constant 0 : index
    %c0_236 = arith.constant 0 : index
    %422 = vector.load %arg3[%c6_234, %c0_235, %c0_236] : memref<27x8x1xf32, #tpu.memory_space<vmem>>, vector<1x8x1xf32>
    %423 = vector.shape_cast %422 : vector<1x8x1xf32> to vector<8x1xf32>
    %424 = vector.broadcast %423 : vector<8x1xf32> to vector<8x128xf32>
    %425 = vector.broadcast %421 : vector<1x128xf32> to vector<8x128xf32>
    %426 = arith.mulf %424, %425 : vector<8x128xf32>
    %427 = arith.addf %351, %426 : vector<8x128xf32>
    %c3_237 = arith.constant 3 : index
    %c0_238 = arith.constant 0 : index
    %c0_239 = arith.constant 0 : index
    %428 = vector.load %arg3[%c3_237, %c0_238, %c0_239] : memref<27x8x1xf32, #tpu.memory_space<vmem>>, vector<1x8x1xf32>
    %429 = vector.shape_cast %428 : vector<1x8x1xf32> to vector<8x1xf32>
    %430 = vector.broadcast %429 : vector<8x1xf32> to vector<8x128xf32>
    %431 = vector.broadcast %421 : vector<1x128xf32> to vector<8x128xf32>
    %432 = arith.mulf %430, %431 : vector<8x128xf32>
    %433 = arith.addf %363, %432 : vector<8x128xf32>
    %c10_240 = arith.constant 10 : index
    %c0_241 = arith.constant 0 : index
    %434 = vector.load %arg1[%c10_240, %c0_241] : memref<12x128xf32, #tpu.memory_space<vmem>>, vector<1x128xf32>
    %c1_i32_242 = arith.constant 1 : i32
    %435 = tpu.dynamic_rotate %434 by %c1_i32_242 dim 1 : vector<1x128xf32>, i32 -> vector<1x128xf32>
    %cst_243 = arith.constant 0.000000e+00 : f32
    %436 = vector.broadcast %cst_243 : f32 to vector<1x128xf32>
    %437 = arith.select %7, %435, %436 : vector<1x128xi1>, vector<1x128xf32>
    %c15 = arith.constant 15 : index
    %c0_244 = arith.constant 0 : index
    %c0_245 = arith.constant 0 : index
    %438 = vector.load %arg3[%c15, %c0_244, %c0_245] : memref<27x8x1xf32, #tpu.memory_space<vmem>>, vector<1x8x1xf32>
    %439 = vector.shape_cast %438 : vector<1x8x1xf32> to vector<8x1xf32>
    %440 = vector.broadcast %439 : vector<8x1xf32> to vector<8x128xf32>
    %441 = vector.broadcast %437 : vector<1x128xf32> to vector<8x128xf32>
    %442 = arith.mulf %440, %441 : vector<8x128xf32>
    %443 = arith.addf %427, %442 : vector<8x128xf32>
    %c12_246 = arith.constant 12 : index
    %c0_247 = arith.constant 0 : index
    %c0_248 = arith.constant 0 : index
    %444 = vector.load %arg3[%c12_246, %c0_247, %c0_248] : memref<27x8x1xf32, #tpu.memory_space<vmem>>, vector<1x8x1xf32>
    %445 = vector.shape_cast %444 : vector<1x8x1xf32> to vector<8x1xf32>
    %446 = vector.broadcast %445 : vector<8x1xf32> to vector<8x128xf32>
    %447 = vector.broadcast %437 : vector<1x128xf32> to vector<8x128xf32>
    %448 = arith.mulf %446, %447 : vector<8x128xf32>
    %449 = arith.addf %433, %448 : vector<8x128xf32>
    %c11_249 = arith.constant 11 : index
    %c0_250 = arith.constant 0 : index
    %450 = vector.load %arg1[%c11_249, %c0_250] : memref<12x128xf32, #tpu.memory_space<vmem>>, vector<1x128xf32>
    %c1_i32_251 = arith.constant 1 : i32
    %451 = tpu.dynamic_rotate %450 by %c1_i32_251 dim 1 : vector<1x128xf32>, i32 -> vector<1x128xf32>
    %cst_252 = arith.constant 0.000000e+00 : f32
    %452 = vector.broadcast %cst_252 : f32 to vector<1x128xf32>
    %453 = arith.select %7, %451, %452 : vector<1x128xi1>, vector<1x128xf32>
    %c24 = arith.constant 24 : index
    %c0_253 = arith.constant 0 : index
    %c0_254 = arith.constant 0 : index
    %454 = vector.load %arg3[%c24, %c0_253, %c0_254] : memref<27x8x1xf32, #tpu.memory_space<vmem>>, vector<1x8x1xf32>
    %455 = vector.shape_cast %454 : vector<1x8x1xf32> to vector<8x1xf32>
    %456 = vector.broadcast %455 : vector<8x1xf32> to vector<8x128xf32>
    %457 = vector.broadcast %453 : vector<1x128xf32> to vector<8x128xf32>
    %458 = arith.mulf %456, %457 : vector<8x128xf32>
    %459 = arith.addf %443, %458 : vector<8x128xf32>
    %c21_255 = arith.constant 21 : index
    %c0_256 = arith.constant 0 : index
    %c0_257 = arith.constant 0 : index
    %460 = vector.load %arg3[%c21_255, %c0_256, %c0_257] : memref<27x8x1xf32, #tpu.memory_space<vmem>>, vector<1x8x1xf32>
    %461 = vector.shape_cast %460 : vector<1x8x1xf32> to vector<8x1xf32>
    %462 = vector.broadcast %461 : vector<8x1xf32> to vector<8x128xf32>
    %463 = vector.broadcast %453 : vector<1x128xf32> to vector<8x128xf32>
    %464 = arith.mulf %462, %463 : vector<8x128xf32>
    %465 = arith.addf %449, %464 : vector<8x128xf32>
    %c6_258 = arith.constant 6 : index
    %c0_259 = arith.constant 0 : index
    %466 = vector.load %arg1[%c6_258, %c0_259] : memref<12x128xf32, #tpu.memory_space<vmem>>, vector<1x128xf32>
    %c7_260 = arith.constant 7 : index
    %c0_261 = arith.constant 0 : index
    %c0_262 = arith.constant 0 : index
    %467 = vector.load %arg3[%c7_260, %c0_261, %c0_262] : memref<27x8x1xf32, #tpu.memory_space<vmem>>, vector<1x8x1xf32>
    %468 = vector.shape_cast %467 : vector<1x8x1xf32> to vector<8x1xf32>
    %469 = vector.broadcast %468 : vector<8x1xf32> to vector<8x128xf32>
    %470 = vector.broadcast %466 : vector<1x128xf32> to vector<8x128xf32>
    %471 = arith.mulf %469, %470 : vector<8x128xf32>
    %472 = arith.addf %459, %471 : vector<8x128xf32>
    %c6_263 = arith.constant 6 : index
    %c0_264 = arith.constant 0 : index
    %c0_265 = arith.constant 0 : index
    %473 = vector.load %arg3[%c6_263, %c0_264, %c0_265] : memref<27x8x1xf32, #tpu.memory_space<vmem>>, vector<1x8x1xf32>
    %474 = vector.shape_cast %473 : vector<1x8x1xf32> to vector<8x1xf32>
    %475 = vector.broadcast %474 : vector<8x1xf32> to vector<8x128xf32>
    %476 = vector.broadcast %466 : vector<1x128xf32> to vector<8x128xf32>
    %477 = arith.mulf %475, %476 : vector<8x128xf32>
    %478 = arith.addf %411, %477 : vector<8x128xf32>
    %c4_266 = arith.constant 4 : index
    %c0_267 = arith.constant 0 : index
    %c0_268 = arith.constant 0 : index
    %479 = vector.load %arg3[%c4_266, %c0_267, %c0_268] : memref<27x8x1xf32, #tpu.memory_space<vmem>>, vector<1x8x1xf32>
    %480 = vector.shape_cast %479 : vector<1x8x1xf32> to vector<8x1xf32>
    %481 = vector.broadcast %480 : vector<8x1xf32> to vector<8x128xf32>
    %482 = vector.broadcast %466 : vector<1x128xf32> to vector<8x128xf32>
    %483 = arith.mulf %481, %482 : vector<8x128xf32>
    %484 = arith.addf %465, %483 : vector<8x128xf32>
    %c3_269 = arith.constant 3 : index
    %c0_270 = arith.constant 0 : index
    %c0_271 = arith.constant 0 : index
    %485 = vector.load %arg3[%c3_269, %c0_270, %c0_271] : memref<27x8x1xf32, #tpu.memory_space<vmem>>, vector<1x8x1xf32>
    %486 = vector.shape_cast %485 : vector<1x8x1xf32> to vector<8x1xf32>
    %487 = vector.broadcast %486 : vector<8x1xf32> to vector<8x128xf32>
    %488 = vector.broadcast %466 : vector<1x128xf32> to vector<8x128xf32>
    %489 = arith.mulf %487, %488 : vector<8x128xf32>
    %490 = arith.addf %417, %489 : vector<8x128xf32>
    %c7_272 = arith.constant 7 : index
    %c0_273 = arith.constant 0 : index
    %491 = vector.load %arg1[%c7_272, %c0_273] : memref<12x128xf32, #tpu.memory_space<vmem>>, vector<1x128xf32>
    %c16 = arith.constant 16 : index
    %c0_274 = arith.constant 0 : index
    %c0_275 = arith.constant 0 : index
    %492 = vector.load %arg3[%c16, %c0_274, %c0_275] : memref<27x8x1xf32, #tpu.memory_space<vmem>>, vector<1x8x1xf32>
    %493 = vector.shape_cast %492 : vector<1x8x1xf32> to vector<8x1xf32>
    %494 = vector.broadcast %493 : vector<8x1xf32> to vector<8x128xf32>
    %495 = vector.broadcast %491 : vector<1x128xf32> to vector<8x128xf32>
    %496 = arith.mulf %494, %495 : vector<8x128xf32>
    %497 = arith.addf %472, %496 : vector<8x128xf32>
    %c15_276 = arith.constant 15 : index
    %c0_277 = arith.constant 0 : index
    %c0_278 = arith.constant 0 : index
    %498 = vector.load %arg3[%c15_276, %c0_277, %c0_278] : memref<27x8x1xf32, #tpu.memory_space<vmem>>, vector<1x8x1xf32>
    %499 = vector.shape_cast %498 : vector<1x8x1xf32> to vector<8x1xf32>
    %500 = vector.broadcast %499 : vector<8x1xf32> to vector<8x128xf32>
    %501 = vector.broadcast %491 : vector<1x128xf32> to vector<8x128xf32>
    %502 = arith.mulf %500, %501 : vector<8x128xf32>
    %503 = arith.addf %478, %502 : vector<8x128xf32>
    %c13_279 = arith.constant 13 : index
    %c0_280 = arith.constant 0 : index
    %c0_281 = arith.constant 0 : index
    %504 = vector.load %arg3[%c13_279, %c0_280, %c0_281] : memref<27x8x1xf32, #tpu.memory_space<vmem>>, vector<1x8x1xf32>
    %505 = vector.shape_cast %504 : vector<1x8x1xf32> to vector<8x1xf32>
    %506 = vector.broadcast %505 : vector<8x1xf32> to vector<8x128xf32>
    %507 = vector.broadcast %491 : vector<1x128xf32> to vector<8x128xf32>
    %508 = arith.mulf %506, %507 : vector<8x128xf32>
    %509 = arith.addf %484, %508 : vector<8x128xf32>
    %c12_282 = arith.constant 12 : index
    %c0_283 = arith.constant 0 : index
    %c0_284 = arith.constant 0 : index
    %510 = vector.load %arg3[%c12_282, %c0_283, %c0_284] : memref<27x8x1xf32, #tpu.memory_space<vmem>>, vector<1x8x1xf32>
    %511 = vector.shape_cast %510 : vector<1x8x1xf32> to vector<8x1xf32>
    %512 = vector.broadcast %511 : vector<8x1xf32> to vector<8x128xf32>
    %513 = vector.broadcast %491 : vector<1x128xf32> to vector<8x128xf32>
    %514 = arith.mulf %512, %513 : vector<8x128xf32>
    %515 = arith.addf %490, %514 : vector<8x128xf32>
    %c8_285 = arith.constant 8 : index
    %c0_286 = arith.constant 0 : index
    %516 = vector.load %arg1[%c8_285, %c0_286] : memref<12x128xf32, #tpu.memory_space<vmem>>, vector<1x128xf32>
    %c25 = arith.constant 25 : index
    %c0_287 = arith.constant 0 : index
    %c0_288 = arith.constant 0 : index
    %517 = vector.load %arg3[%c25, %c0_287, %c0_288] : memref<27x8x1xf32, #tpu.memory_space<vmem>>, vector<1x8x1xf32>
    %518 = vector.shape_cast %517 : vector<1x8x1xf32> to vector<8x1xf32>
    %519 = vector.broadcast %518 : vector<8x1xf32> to vector<8x128xf32>
    %520 = vector.broadcast %516 : vector<1x128xf32> to vector<8x128xf32>
    %521 = arith.mulf %519, %520 : vector<8x128xf32>
    %522 = arith.addf %497, %521 : vector<8x128xf32>
    %c24_289 = arith.constant 24 : index
    %c0_290 = arith.constant 0 : index
    %c0_291 = arith.constant 0 : index
    %523 = vector.load %arg3[%c24_289, %c0_290, %c0_291] : memref<27x8x1xf32, #tpu.memory_space<vmem>>, vector<1x8x1xf32>
    %524 = vector.shape_cast %523 : vector<1x8x1xf32> to vector<8x1xf32>
    %525 = vector.broadcast %524 : vector<8x1xf32> to vector<8x128xf32>
    %526 = vector.broadcast %516 : vector<1x128xf32> to vector<8x128xf32>
    %527 = arith.mulf %525, %526 : vector<8x128xf32>
    %528 = arith.addf %503, %527 : vector<8x128xf32>
    %c22_292 = arith.constant 22 : index
    %c0_293 = arith.constant 0 : index
    %c0_294 = arith.constant 0 : index
    %529 = vector.load %arg3[%c22_292, %c0_293, %c0_294] : memref<27x8x1xf32, #tpu.memory_space<vmem>>, vector<1x8x1xf32>
    %530 = vector.shape_cast %529 : vector<1x8x1xf32> to vector<8x1xf32>
    %531 = vector.broadcast %530 : vector<8x1xf32> to vector<8x128xf32>
    %532 = vector.broadcast %516 : vector<1x128xf32> to vector<8x128xf32>
    %533 = arith.mulf %531, %532 : vector<8x128xf32>
    %534 = arith.addf %509, %533 : vector<8x128xf32>
    %c21_295 = arith.constant 21 : index
    %c0_296 = arith.constant 0 : index
    %c0_297 = arith.constant 0 : index
    %535 = vector.load %arg3[%c21_295, %c0_296, %c0_297] : memref<27x8x1xf32, #tpu.memory_space<vmem>>, vector<1x8x1xf32>
    %536 = vector.shape_cast %535 : vector<1x8x1xf32> to vector<8x1xf32>
    %537 = vector.broadcast %536 : vector<8x1xf32> to vector<8x128xf32>
    %538 = vector.broadcast %516 : vector<1x128xf32> to vector<8x128xf32>
    %539 = arith.mulf %537, %538 : vector<8x128xf32>
    %540 = arith.addf %515, %539 : vector<8x128xf32>
    %c9_298 = arith.constant 9 : index
    %c0_299 = arith.constant 0 : index
    %541 = vector.load %arg1[%c9_298, %c0_299] : memref<12x128xf32, #tpu.memory_space<vmem>>, vector<1x128xf32>
    %c8_300 = arith.constant 8 : index
    %c0_301 = arith.constant 0 : index
    %c0_302 = arith.constant 0 : index
    %542 = vector.load %arg3[%c8_300, %c0_301, %c0_302] : memref<27x8x1xf32, #tpu.memory_space<vmem>>, vector<1x8x1xf32>
    %543 = vector.shape_cast %542 : vector<1x8x1xf32> to vector<8x1xf32>
    %544 = vector.broadcast %543 : vector<8x1xf32> to vector<8x128xf32>
    %545 = vector.broadcast %541 : vector<1x128xf32> to vector<8x128xf32>
    %546 = arith.mulf %544, %545 : vector<8x128xf32>
    %547 = arith.addf %522, %546 : vector<8x128xf32>
    %c7_303 = arith.constant 7 : index
    %c0_304 = arith.constant 0 : index
    %c0_305 = arith.constant 0 : index
    %548 = vector.load %arg3[%c7_303, %c0_304, %c0_305] : memref<27x8x1xf32, #tpu.memory_space<vmem>>, vector<1x8x1xf32>
    %549 = vector.shape_cast %548 : vector<1x8x1xf32> to vector<8x1xf32>
    %550 = vector.broadcast %549 : vector<8x1xf32> to vector<8x128xf32>
    %551 = vector.broadcast %541 : vector<1x128xf32> to vector<8x128xf32>
    %552 = arith.mulf %550, %551 : vector<8x128xf32>
    %553 = arith.addf %528, %552 : vector<8x128xf32>
    %c5_306 = arith.constant 5 : index
    %c0_307 = arith.constant 0 : index
    %c0_308 = arith.constant 0 : index
    %554 = vector.load %arg3[%c5_306, %c0_307, %c0_308] : memref<27x8x1xf32, #tpu.memory_space<vmem>>, vector<1x8x1xf32>
    %555 = vector.shape_cast %554 : vector<1x8x1xf32> to vector<8x1xf32>
    %556 = vector.broadcast %555 : vector<8x1xf32> to vector<8x128xf32>
    %557 = vector.broadcast %541 : vector<1x128xf32> to vector<8x128xf32>
    %558 = arith.mulf %556, %557 : vector<8x128xf32>
    %559 = arith.addf %534, %558 : vector<8x128xf32>
    %c4_309 = arith.constant 4 : index
    %c0_310 = arith.constant 0 : index
    %c0_311 = arith.constant 0 : index
    %560 = vector.load %arg3[%c4_309, %c0_310, %c0_311] : memref<27x8x1xf32, #tpu.memory_space<vmem>>, vector<1x8x1xf32>
    %561 = vector.shape_cast %560 : vector<1x8x1xf32> to vector<8x1xf32>
    %562 = vector.broadcast %561 : vector<8x1xf32> to vector<8x128xf32>
    %563 = vector.broadcast %541 : vector<1x128xf32> to vector<8x128xf32>
    %564 = arith.mulf %562, %563 : vector<8x128xf32>
    %565 = arith.addf %540, %564 : vector<8x128xf32>
    %c10_312 = arith.constant 10 : index
    %c0_313 = arith.constant 0 : index
    %566 = vector.load %arg1[%c10_312, %c0_313] : memref<12x128xf32, #tpu.memory_space<vmem>>, vector<1x128xf32>
    %c17 = arith.constant 17 : index
    %c0_314 = arith.constant 0 : index
    %c0_315 = arith.constant 0 : index
    %567 = vector.load %arg3[%c17, %c0_314, %c0_315] : memref<27x8x1xf32, #tpu.memory_space<vmem>>, vector<1x8x1xf32>
    %568 = vector.shape_cast %567 : vector<1x8x1xf32> to vector<8x1xf32>
    %569 = vector.broadcast %568 : vector<8x1xf32> to vector<8x128xf32>
    %570 = vector.broadcast %566 : vector<1x128xf32> to vector<8x128xf32>
    %571 = arith.mulf %569, %570 : vector<8x128xf32>
    %572 = arith.addf %547, %571 : vector<8x128xf32>
    %c16_316 = arith.constant 16 : index
    %c0_317 = arith.constant 0 : index
    %c0_318 = arith.constant 0 : index
    %573 = vector.load %arg3[%c16_316, %c0_317, %c0_318] : memref<27x8x1xf32, #tpu.memory_space<vmem>>, vector<1x8x1xf32>
    %574 = vector.shape_cast %573 : vector<1x8x1xf32> to vector<8x1xf32>
    %575 = vector.broadcast %574 : vector<8x1xf32> to vector<8x128xf32>
    %576 = vector.broadcast %566 : vector<1x128xf32> to vector<8x128xf32>
    %577 = arith.mulf %575, %576 : vector<8x128xf32>
    %578 = arith.addf %553, %577 : vector<8x128xf32>
    %c14_319 = arith.constant 14 : index
    %c0_320 = arith.constant 0 : index
    %c0_321 = arith.constant 0 : index
    %579 = vector.load %arg3[%c14_319, %c0_320, %c0_321] : memref<27x8x1xf32, #tpu.memory_space<vmem>>, vector<1x8x1xf32>
    %580 = vector.shape_cast %579 : vector<1x8x1xf32> to vector<8x1xf32>
    %581 = vector.broadcast %580 : vector<8x1xf32> to vector<8x128xf32>
    %582 = vector.broadcast %566 : vector<1x128xf32> to vector<8x128xf32>
    %583 = arith.mulf %581, %582 : vector<8x128xf32>
    %584 = arith.addf %559, %583 : vector<8x128xf32>
    %c13_322 = arith.constant 13 : index
    %c0_323 = arith.constant 0 : index
    %c0_324 = arith.constant 0 : index
    %585 = vector.load %arg3[%c13_322, %c0_323, %c0_324] : memref<27x8x1xf32, #tpu.memory_space<vmem>>, vector<1x8x1xf32>
    %586 = vector.shape_cast %585 : vector<1x8x1xf32> to vector<8x1xf32>
    %587 = vector.broadcast %586 : vector<8x1xf32> to vector<8x128xf32>
    %588 = vector.broadcast %566 : vector<1x128xf32> to vector<8x128xf32>
    %589 = arith.mulf %587, %588 : vector<8x128xf32>
    %590 = arith.addf %565, %589 : vector<8x128xf32>
    %c11_325 = arith.constant 11 : index
    %c0_326 = arith.constant 0 : index
    %591 = vector.load %arg1[%c11_325, %c0_326] : memref<12x128xf32, #tpu.memory_space<vmem>>, vector<1x128xf32>
    %c26 = arith.constant 26 : index
    %c0_327 = arith.constant 0 : index
    %c0_328 = arith.constant 0 : index
    %592 = vector.load %arg3[%c26, %c0_327, %c0_328] : memref<27x8x1xf32, #tpu.memory_space<vmem>>, vector<1x8x1xf32>
    %593 = vector.shape_cast %592 : vector<1x8x1xf32> to vector<8x1xf32>
    %594 = vector.broadcast %593 : vector<8x1xf32> to vector<8x128xf32>
    %595 = vector.broadcast %591 : vector<1x128xf32> to vector<8x128xf32>
    %596 = arith.mulf %594, %595 : vector<8x128xf32>
    %597 = arith.addf %572, %596 : vector<8x128xf32>
    %c25_329 = arith.constant 25 : index
    %c0_330 = arith.constant 0 : index
    %c0_331 = arith.constant 0 : index
    %598 = vector.load %arg3[%c25_329, %c0_330, %c0_331] : memref<27x8x1xf32, #tpu.memory_space<vmem>>, vector<1x8x1xf32>
    %599 = vector.shape_cast %598 : vector<1x8x1xf32> to vector<8x1xf32>
    %600 = vector.broadcast %599 : vector<8x1xf32> to vector<8x128xf32>
    %601 = vector.broadcast %591 : vector<1x128xf32> to vector<8x128xf32>
    %602 = arith.mulf %600, %601 : vector<8x128xf32>
    %603 = arith.addf %578, %602 : vector<8x128xf32>
    %c23_332 = arith.constant 23 : index
    %c0_333 = arith.constant 0 : index
    %c0_334 = arith.constant 0 : index
    %604 = vector.load %arg3[%c23_332, %c0_333, %c0_334] : memref<27x8x1xf32, #tpu.memory_space<vmem>>, vector<1x8x1xf32>
    %605 = vector.shape_cast %604 : vector<1x8x1xf32> to vector<8x1xf32>
    %606 = vector.broadcast %605 : vector<8x1xf32> to vector<8x128xf32>
    %607 = vector.broadcast %591 : vector<1x128xf32> to vector<8x128xf32>
    %608 = arith.mulf %606, %607 : vector<8x128xf32>
    %609 = arith.addf %584, %608 : vector<8x128xf32>
    %c22_335 = arith.constant 22 : index
    %c0_336 = arith.constant 0 : index
    %c0_337 = arith.constant 0 : index
    %610 = vector.load %arg3[%c22_335, %c0_336, %c0_337] : memref<27x8x1xf32, #tpu.memory_space<vmem>>, vector<1x8x1xf32>
    %611 = vector.shape_cast %610 : vector<1x8x1xf32> to vector<8x1xf32>
    %612 = vector.broadcast %611 : vector<8x1xf32> to vector<8x128xf32>
    %613 = vector.broadcast %591 : vector<1x128xf32> to vector<8x128xf32>
    %614 = arith.mulf %612, %613 : vector<8x128xf32>
    %615 = arith.addf %590, %614 : vector<8x128xf32>
    %c6_338 = arith.constant 6 : index
    %c0_339 = arith.constant 0 : index
    %616 = vector.load %arg1[%c6_338, %c0_339] : memref<12x128xf32, #tpu.memory_space<vmem>>, vector<1x128xf32>
    %c127_i32_340 = arith.constant 127 : i32
    %617 = tpu.dynamic_rotate %616 by %c127_i32_340 dim 1 : vector<1x128xf32>, i32 -> vector<1x128xf32>
    %cst_341 = arith.constant 0.000000e+00 : f32
    %618 = vector.broadcast %cst_341 : f32 to vector<1x128xf32>
    %619 = arith.select %9, %617, %618 : vector<1x128xi1>, vector<1x128xf32>
    %c8_342 = arith.constant 8 : index
    %c0_343 = arith.constant 0 : index
    %c0_344 = arith.constant 0 : index
    %620 = vector.load %arg3[%c8_342, %c0_343, %c0_344] : memref<27x8x1xf32, #tpu.memory_space<vmem>>, vector<1x8x1xf32>
    %621 = vector.shape_cast %620 : vector<1x8x1xf32> to vector<8x1xf32>
    %622 = vector.broadcast %621 : vector<8x1xf32> to vector<8x128xf32>
    %623 = vector.broadcast %619 : vector<1x128xf32> to vector<8x128xf32>
    %624 = arith.mulf %622, %623 : vector<8x128xf32>
    %625 = arith.addf %603, %624 : vector<8x128xf32>
    %c5_345 = arith.constant 5 : index
    %c0_346 = arith.constant 0 : index
    %c0_347 = arith.constant 0 : index
    %626 = vector.load %arg3[%c5_345, %c0_346, %c0_347] : memref<27x8x1xf32, #tpu.memory_space<vmem>>, vector<1x8x1xf32>
    %627 = vector.shape_cast %626 : vector<1x8x1xf32> to vector<8x1xf32>
    %628 = vector.broadcast %627 : vector<8x1xf32> to vector<8x128xf32>
    %629 = vector.broadcast %619 : vector<1x128xf32> to vector<8x128xf32>
    %630 = arith.mulf %628, %629 : vector<8x128xf32>
    %631 = arith.addf %615, %630 : vector<8x128xf32>
    %c7_348 = arith.constant 7 : index
    %c0_349 = arith.constant 0 : index
    %632 = vector.load %arg1[%c7_348, %c0_349] : memref<12x128xf32, #tpu.memory_space<vmem>>, vector<1x128xf32>
    %c127_i32_350 = arith.constant 127 : i32
    %633 = tpu.dynamic_rotate %632 by %c127_i32_350 dim 1 : vector<1x128xf32>, i32 -> vector<1x128xf32>
    %cst_351 = arith.constant 0.000000e+00 : f32
    %634 = vector.broadcast %cst_351 : f32 to vector<1x128xf32>
    %635 = arith.select %9, %633, %634 : vector<1x128xi1>, vector<1x128xf32>
    %c17_352 = arith.constant 17 : index
    %c0_353 = arith.constant 0 : index
    %c0_354 = arith.constant 0 : index
    %636 = vector.load %arg3[%c17_352, %c0_353, %c0_354] : memref<27x8x1xf32, #tpu.memory_space<vmem>>, vector<1x8x1xf32>
    %637 = vector.shape_cast %636 : vector<1x8x1xf32> to vector<8x1xf32>
    %638 = vector.broadcast %637 : vector<8x1xf32> to vector<8x128xf32>
    %639 = vector.broadcast %635 : vector<1x128xf32> to vector<8x128xf32>
    %640 = arith.mulf %638, %639 : vector<8x128xf32>
    %641 = arith.addf %625, %640 : vector<8x128xf32>
    %c14_355 = arith.constant 14 : index
    %c0_356 = arith.constant 0 : index
    %c0_357 = arith.constant 0 : index
    %642 = vector.load %arg3[%c14_355, %c0_356, %c0_357] : memref<27x8x1xf32, #tpu.memory_space<vmem>>, vector<1x8x1xf32>
    %643 = vector.shape_cast %642 : vector<1x8x1xf32> to vector<8x1xf32>
    %644 = vector.broadcast %643 : vector<8x1xf32> to vector<8x128xf32>
    %645 = vector.broadcast %635 : vector<1x128xf32> to vector<8x128xf32>
    %646 = arith.mulf %644, %645 : vector<8x128xf32>
    %647 = arith.addf %631, %646 : vector<8x128xf32>
    %c8_358 = arith.constant 8 : index
    %c0_359 = arith.constant 0 : index
    %648 = vector.load %arg1[%c8_358, %c0_359] : memref<12x128xf32, #tpu.memory_space<vmem>>, vector<1x128xf32>
    %c127_i32_360 = arith.constant 127 : i32
    %649 = tpu.dynamic_rotate %648 by %c127_i32_360 dim 1 : vector<1x128xf32>, i32 -> vector<1x128xf32>
    %cst_361 = arith.constant 0.000000e+00 : f32
    %650 = vector.broadcast %cst_361 : f32 to vector<1x128xf32>
    %651 = arith.select %9, %649, %650 : vector<1x128xi1>, vector<1x128xf32>
    %c26_362 = arith.constant 26 : index
    %c0_363 = arith.constant 0 : index
    %c0_364 = arith.constant 0 : index
    %652 = vector.load %arg3[%c26_362, %c0_363, %c0_364] : memref<27x8x1xf32, #tpu.memory_space<vmem>>, vector<1x8x1xf32>
    %653 = vector.shape_cast %652 : vector<1x8x1xf32> to vector<8x1xf32>
    %654 = vector.broadcast %653 : vector<8x1xf32> to vector<8x128xf32>
    %655 = vector.broadcast %651 : vector<1x128xf32> to vector<8x128xf32>
    %656 = arith.mulf %654, %655 : vector<8x128xf32>
    %657 = arith.addf %641, %656 : vector<8x128xf32>
    %c23_365 = arith.constant 23 : index
    %c0_366 = arith.constant 0 : index
    %c0_367 = arith.constant 0 : index
    %658 = vector.load %arg3[%c23_365, %c0_366, %c0_367] : memref<27x8x1xf32, #tpu.memory_space<vmem>>, vector<1x8x1xf32>
    %659 = vector.shape_cast %658 : vector<1x8x1xf32> to vector<8x1xf32>
    %660 = vector.broadcast %659 : vector<8x1xf32> to vector<8x128xf32>
    %661 = vector.broadcast %651 : vector<1x128xf32> to vector<8x128xf32>
    %662 = arith.mulf %660, %661 : vector<8x128xf32>
    %663 = arith.addf %647, %662 : vector<8x128xf32>
    %664 = arith.andi %5, %7 : vector<1x128xi1>
    %c3_368 = arith.constant 3 : index
    %c0_369 = arith.constant 0 : index
    %665 = vector.load %arg1[%c3_368, %c0_369] : memref<12x128xf32, #tpu.memory_space<vmem>>, vector<1x128xf32>
    %c121_i32 = arith.constant 121 : i32
    %666 = tpu.dynamic_rotate %665 by %c121_i32 dim 1 : vector<1x128xf32>, i32 -> vector<1x128xf32>
    %cst_370 = arith.constant 0.000000e+00 : f32
    %667 = vector.broadcast %cst_370 : f32 to vector<1x128xf32>
    %668 = arith.select %664, %666, %667 : vector<1x128xi1>, vector<1x128xf32>
    %c6_371 = arith.constant 6 : index
    %c0_372 = arith.constant 0 : index
    %c0_373 = arith.constant 0 : index
    %669 = vector.load %arg3[%c6_371, %c0_372, %c0_373] : memref<27x8x1xf32, #tpu.memory_space<vmem>>, vector<1x8x1xf32>
    %670 = vector.shape_cast %669 : vector<1x8x1xf32> to vector<8x1xf32>
    %671 = vector.broadcast %670 : vector<8x1xf32> to vector<8x128xf32>
    %672 = vector.broadcast %668 : vector<1x128xf32> to vector<8x128xf32>
    %673 = arith.mulf %671, %672 : vector<8x128xf32>
    %674 = arith.addf %609, %673 : vector<8x128xf32>
    %c4_374 = arith.constant 4 : index
    %c0_375 = arith.constant 0 : index
    %675 = vector.load %arg1[%c4_374, %c0_375] : memref<12x128xf32, #tpu.memory_space<vmem>>, vector<1x128xf32>
    %c121_i32_376 = arith.constant 121 : i32
    %676 = tpu.dynamic_rotate %675 by %c121_i32_376 dim 1 : vector<1x128xf32>, i32 -> vector<1x128xf32>
    %cst_377 = arith.constant 0.000000e+00 : f32
    %677 = vector.broadcast %cst_377 : f32 to vector<1x128xf32>
    %678 = arith.select %664, %676, %677 : vector<1x128xi1>, vector<1x128xf32>
    %c15_378 = arith.constant 15 : index
    %c0_379 = arith.constant 0 : index
    %c0_380 = arith.constant 0 : index
    %679 = vector.load %arg3[%c15_378, %c0_379, %c0_380] : memref<27x8x1xf32, #tpu.memory_space<vmem>>, vector<1x8x1xf32>
    %680 = vector.shape_cast %679 : vector<1x8x1xf32> to vector<8x1xf32>
    %681 = vector.broadcast %680 : vector<8x1xf32> to vector<8x128xf32>
    %682 = vector.broadcast %678 : vector<1x128xf32> to vector<8x128xf32>
    %683 = arith.mulf %681, %682 : vector<8x128xf32>
    %684 = arith.addf %674, %683 : vector<8x128xf32>
    %c5_381 = arith.constant 5 : index
    %c0_382 = arith.constant 0 : index
    %685 = vector.load %arg1[%c5_381, %c0_382] : memref<12x128xf32, #tpu.memory_space<vmem>>, vector<1x128xf32>
    %c121_i32_383 = arith.constant 121 : i32
    %686 = tpu.dynamic_rotate %685 by %c121_i32_383 dim 1 : vector<1x128xf32>, i32 -> vector<1x128xf32>
    %cst_384 = arith.constant 0.000000e+00 : f32
    %687 = vector.broadcast %cst_384 : f32 to vector<1x128xf32>
    %688 = arith.select %664, %686, %687 : vector<1x128xi1>, vector<1x128xf32>
    %c24_385 = arith.constant 24 : index
    %c0_386 = arith.constant 0 : index
    %c0_387 = arith.constant 0 : index
    %689 = vector.load %arg3[%c24_385, %c0_386, %c0_387] : memref<27x8x1xf32, #tpu.memory_space<vmem>>, vector<1x8x1xf32>
    %690 = vector.shape_cast %689 : vector<1x8x1xf32> to vector<8x1xf32>
    %691 = vector.broadcast %690 : vector<8x1xf32> to vector<8x128xf32>
    %692 = vector.broadcast %688 : vector<1x128xf32> to vector<8x128xf32>
    %693 = arith.mulf %691, %692 : vector<8x128xf32>
    %694 = arith.addf %684, %693 : vector<8x128xf32>
    %c0_388 = arith.constant 0 : index
    %c0_389 = arith.constant 0 : index
    %695 = vector.load %arg1[%c0_388, %c0_389] : memref<12x128xf32, #tpu.memory_space<vmem>>, vector<1x128xf32>
    %c120_i32 = arith.constant 120 : i32
    %696 = tpu.dynamic_rotate %695 by %c120_i32 dim 1 : vector<1x128xf32>, i32 -> vector<1x128xf32>
    %cst_390 = arith.constant 0.000000e+00 : f32
    %697 = vector.broadcast %cst_390 : f32 to vector<1x128xf32>
    %698 = arith.select %5, %696, %697 : vector<1x128xi1>, vector<1x128xf32>
    %c7_391 = arith.constant 7 : index
    %c0_392 = arith.constant 0 : index
    %c0_393 = arith.constant 0 : index
    %699 = vector.load %arg3[%c7_391, %c0_392, %c0_393] : memref<27x8x1xf32, #tpu.memory_space<vmem>>, vector<1x8x1xf32>
    %700 = vector.shape_cast %699 : vector<1x8x1xf32> to vector<8x1xf32>
    %701 = vector.broadcast %700 : vector<8x1xf32> to vector<8x128xf32>
    %702 = vector.broadcast %698 : vector<1x128xf32> to vector<8x128xf32>
    %703 = arith.mulf %701, %702 : vector<8x128xf32>
    %704 = arith.addf %694, %703 : vector<8x128xf32>
    %c6_394 = arith.constant 6 : index
    %c0_395 = arith.constant 0 : index
    %c0_396 = arith.constant 0 : index
    %705 = vector.load %arg3[%c6_394, %c0_395, %c0_396] : memref<27x8x1xf32, #tpu.memory_space<vmem>>, vector<1x8x1xf32>
    %706 = vector.shape_cast %705 : vector<1x8x1xf32> to vector<8x1xf32>
    %707 = vector.broadcast %706 : vector<8x1xf32> to vector<8x128xf32>
    %708 = vector.broadcast %698 : vector<1x128xf32> to vector<8x128xf32>
    %709 = arith.mulf %707, %708 : vector<8x128xf32>
    %710 = arith.addf %663, %709 : vector<8x128xf32>
    %c1_397 = arith.constant 1 : index
    %c0_398 = arith.constant 0 : index
    %711 = vector.load %arg1[%c1_397, %c0_398] : memref<12x128xf32, #tpu.memory_space<vmem>>, vector<1x128xf32>
    %c120_i32_399 = arith.constant 120 : i32
    %712 = tpu.dynamic_rotate %711 by %c120_i32_399 dim 1 : vector<1x128xf32>, i32 -> vector<1x128xf32>
    %cst_400 = arith.constant 0.000000e+00 : f32
    %713 = vector.broadcast %cst_400 : f32 to vector<1x128xf32>
    %714 = arith.select %5, %712, %713 : vector<1x128xi1>, vector<1x128xf32>
    %c16_401 = arith.constant 16 : index
    %c0_402 = arith.constant 0 : index
    %c0_403 = arith.constant 0 : index
    %715 = vector.load %arg3[%c16_401, %c0_402, %c0_403] : memref<27x8x1xf32, #tpu.memory_space<vmem>>, vector<1x8x1xf32>
    %716 = vector.shape_cast %715 : vector<1x8x1xf32> to vector<8x1xf32>
    %717 = vector.broadcast %716 : vector<8x1xf32> to vector<8x128xf32>
    %718 = vector.broadcast %714 : vector<1x128xf32> to vector<8x128xf32>
    %719 = arith.mulf %717, %718 : vector<8x128xf32>
    %720 = arith.addf %704, %719 : vector<8x128xf32>
    %c15_404 = arith.constant 15 : index
    %c0_405 = arith.constant 0 : index
    %c0_406 = arith.constant 0 : index
    %721 = vector.load %arg3[%c15_404, %c0_405, %c0_406] : memref<27x8x1xf32, #tpu.memory_space<vmem>>, vector<1x8x1xf32>
    %722 = vector.shape_cast %721 : vector<1x8x1xf32> to vector<8x1xf32>
    %723 = vector.broadcast %722 : vector<8x1xf32> to vector<8x128xf32>
    %724 = vector.broadcast %714 : vector<1x128xf32> to vector<8x128xf32>
    %725 = arith.mulf %723, %724 : vector<8x128xf32>
    %726 = arith.addf %710, %725 : vector<8x128xf32>
    %c2_407 = arith.constant 2 : index
    %c0_408 = arith.constant 0 : index
    %727 = vector.load %arg1[%c2_407, %c0_408] : memref<12x128xf32, #tpu.memory_space<vmem>>, vector<1x128xf32>
    %c120_i32_409 = arith.constant 120 : i32
    %728 = tpu.dynamic_rotate %727 by %c120_i32_409 dim 1 : vector<1x128xf32>, i32 -> vector<1x128xf32>
    %cst_410 = arith.constant 0.000000e+00 : f32
    %729 = vector.broadcast %cst_410 : f32 to vector<1x128xf32>
    %730 = arith.select %5, %728, %729 : vector<1x128xi1>, vector<1x128xf32>
    %c25_411 = arith.constant 25 : index
    %c0_412 = arith.constant 0 : index
    %c0_413 = arith.constant 0 : index
    %731 = vector.load %arg3[%c25_411, %c0_412, %c0_413] : memref<27x8x1xf32, #tpu.memory_space<vmem>>, vector<1x8x1xf32>
    %732 = vector.shape_cast %731 : vector<1x8x1xf32> to vector<8x1xf32>
    %733 = vector.broadcast %732 : vector<8x1xf32> to vector<8x128xf32>
    %734 = vector.broadcast %730 : vector<1x128xf32> to vector<8x128xf32>
    %735 = arith.mulf %733, %734 : vector<8x128xf32>
    %736 = arith.addf %720, %735 : vector<8x128xf32>
    %c24_414 = arith.constant 24 : index
    %c0_415 = arith.constant 0 : index
    %c0_416 = arith.constant 0 : index
    %737 = vector.load %arg3[%c24_414, %c0_415, %c0_416] : memref<27x8x1xf32, #tpu.memory_space<vmem>>, vector<1x8x1xf32>
    %738 = vector.shape_cast %737 : vector<1x8x1xf32> to vector<8x1xf32>
    %739 = vector.broadcast %738 : vector<8x1xf32> to vector<8x128xf32>
    %740 = vector.broadcast %730 : vector<1x128xf32> to vector<8x128xf32>
    %741 = arith.mulf %739, %740 : vector<8x128xf32>
    %742 = arith.addf %726, %741 : vector<8x128xf32>
    %c3_417 = arith.constant 3 : index
    %c0_418 = arith.constant 0 : index
    %743 = vector.load %arg1[%c3_417, %c0_418] : memref<12x128xf32, #tpu.memory_space<vmem>>, vector<1x128xf32>
    %c120_i32_419 = arith.constant 120 : i32
    %744 = tpu.dynamic_rotate %743 by %c120_i32_419 dim 1 : vector<1x128xf32>, i32 -> vector<1x128xf32>
    %cst_420 = arith.constant 0.000000e+00 : f32
    %745 = vector.broadcast %cst_420 : f32 to vector<1x128xf32>
    %746 = arith.select %5, %744, %745 : vector<1x128xi1>, vector<1x128xf32>
    %c8_421 = arith.constant 8 : index
    %c0_422 = arith.constant 0 : index
    %c0_423 = arith.constant 0 : index
    %747 = vector.load %arg3[%c8_421, %c0_422, %c0_423] : memref<27x8x1xf32, #tpu.memory_space<vmem>>, vector<1x8x1xf32>
    %748 = vector.shape_cast %747 : vector<1x8x1xf32> to vector<8x1xf32>
    %749 = vector.broadcast %748 : vector<8x1xf32> to vector<8x128xf32>
    %750 = vector.broadcast %746 : vector<1x128xf32> to vector<8x128xf32>
    %751 = arith.mulf %749, %750 : vector<8x128xf32>
    %752 = arith.addf %736, %751 : vector<8x128xf32>
    %c7_424 = arith.constant 7 : index
    %c0_425 = arith.constant 0 : index
    %c0_426 = arith.constant 0 : index
    %753 = vector.load %arg3[%c7_424, %c0_425, %c0_426] : memref<27x8x1xf32, #tpu.memory_space<vmem>>, vector<1x8x1xf32>
    %754 = vector.shape_cast %753 : vector<1x8x1xf32> to vector<8x1xf32>
    %755 = vector.broadcast %754 : vector<8x1xf32> to vector<8x128xf32>
    %756 = vector.broadcast %746 : vector<1x128xf32> to vector<8x128xf32>
    %757 = arith.mulf %755, %756 : vector<8x128xf32>
    %758 = arith.addf %742, %757 : vector<8x128xf32>
    %c4_427 = arith.constant 4 : index
    %c0_428 = arith.constant 0 : index
    %759 = vector.load %arg1[%c4_427, %c0_428] : memref<12x128xf32, #tpu.memory_space<vmem>>, vector<1x128xf32>
    %c120_i32_429 = arith.constant 120 : i32
    %760 = tpu.dynamic_rotate %759 by %c120_i32_429 dim 1 : vector<1x128xf32>, i32 -> vector<1x128xf32>
    %cst_430 = arith.constant 0.000000e+00 : f32
    %761 = vector.broadcast %cst_430 : f32 to vector<1x128xf32>
    %762 = arith.select %5, %760, %761 : vector<1x128xi1>, vector<1x128xf32>
    %c17_431 = arith.constant 17 : index
    %c0_432 = arith.constant 0 : index
    %c0_433 = arith.constant 0 : index
    %763 = vector.load %arg3[%c17_431, %c0_432, %c0_433] : memref<27x8x1xf32, #tpu.memory_space<vmem>>, vector<1x8x1xf32>
    %764 = vector.shape_cast %763 : vector<1x8x1xf32> to vector<8x1xf32>
    %765 = vector.broadcast %764 : vector<8x1xf32> to vector<8x128xf32>
    %766 = vector.broadcast %762 : vector<1x128xf32> to vector<8x128xf32>
    %767 = arith.mulf %765, %766 : vector<8x128xf32>
    %768 = arith.addf %752, %767 : vector<8x128xf32>
    %c16_434 = arith.constant 16 : index
    %c0_435 = arith.constant 0 : index
    %c0_436 = arith.constant 0 : index
    %769 = vector.load %arg3[%c16_434, %c0_435, %c0_436] : memref<27x8x1xf32, #tpu.memory_space<vmem>>, vector<1x8x1xf32>
    %770 = vector.shape_cast %769 : vector<1x8x1xf32> to vector<8x1xf32>
    %771 = vector.broadcast %770 : vector<8x1xf32> to vector<8x128xf32>
    %772 = vector.broadcast %762 : vector<1x128xf32> to vector<8x128xf32>
    %773 = arith.mulf %771, %772 : vector<8x128xf32>
    %774 = arith.addf %758, %773 : vector<8x128xf32>
    %c5_437 = arith.constant 5 : index
    %c0_438 = arith.constant 0 : index
    %775 = vector.load %arg1[%c5_437, %c0_438] : memref<12x128xf32, #tpu.memory_space<vmem>>, vector<1x128xf32>
    %c120_i32_439 = arith.constant 120 : i32
    %776 = tpu.dynamic_rotate %775 by %c120_i32_439 dim 1 : vector<1x128xf32>, i32 -> vector<1x128xf32>
    %cst_440 = arith.constant 0.000000e+00 : f32
    %777 = vector.broadcast %cst_440 : f32 to vector<1x128xf32>
    %778 = arith.select %5, %776, %777 : vector<1x128xi1>, vector<1x128xf32>
    %c26_441 = arith.constant 26 : index
    %c0_442 = arith.constant 0 : index
    %c0_443 = arith.constant 0 : index
    %779 = vector.load %arg3[%c26_441, %c0_442, %c0_443] : memref<27x8x1xf32, #tpu.memory_space<vmem>>, vector<1x8x1xf32>
    %780 = vector.shape_cast %779 : vector<1x8x1xf32> to vector<8x1xf32>
    %781 = vector.broadcast %780 : vector<8x1xf32> to vector<8x128xf32>
    %782 = vector.broadcast %778 : vector<1x128xf32> to vector<8x128xf32>
    %783 = arith.mulf %781, %782 : vector<8x128xf32>
    %784 = arith.addf %768, %783 : vector<8x128xf32>
    %c25_444 = arith.constant 25 : index
    %c0_445 = arith.constant 0 : index
    %c0_446 = arith.constant 0 : index
    %785 = vector.load %arg3[%c25_444, %c0_445, %c0_446] : memref<27x8x1xf32, #tpu.memory_space<vmem>>, vector<1x8x1xf32>
    %786 = vector.shape_cast %785 : vector<1x8x1xf32> to vector<8x1xf32>
    %787 = vector.broadcast %786 : vector<8x1xf32> to vector<8x128xf32>
    %788 = vector.broadcast %778 : vector<1x128xf32> to vector<8x128xf32>
    %789 = arith.mulf %787, %788 : vector<8x128xf32>
    %790 = arith.addf %774, %789 : vector<8x128xf32>
    %791 = arith.andi %5, %9 : vector<1x128xi1>
    %c0_447 = arith.constant 0 : index
    %c0_448 = arith.constant 0 : index
    %792 = vector.load %arg1[%c0_447, %c0_448] : memref<12x128xf32, #tpu.memory_space<vmem>>, vector<1x128xf32>
    %c119_i32 = arith.constant 119 : i32
    %793 = tpu.dynamic_rotate %792 by %c119_i32 dim 1 : vector<1x128xf32>, i32 -> vector<1x128xf32>
    %cst_449 = arith.constant 0.000000e+00 : f32
    %794 = vector.broadcast %cst_449 : f32 to vector<1x128xf32>
    %795 = arith.select %791, %793, %794 : vector<1x128xi1>, vector<1x128xf32>
    %c8_450 = arith.constant 8 : index
    %c0_451 = arith.constant 0 : index
    %c0_452 = arith.constant 0 : index
    %796 = vector.load %arg3[%c8_450, %c0_451, %c0_452] : memref<27x8x1xf32, #tpu.memory_space<vmem>>, vector<1x8x1xf32>
    %797 = vector.shape_cast %796 : vector<1x8x1xf32> to vector<8x1xf32>
    %798 = vector.broadcast %797 : vector<8x1xf32> to vector<8x128xf32>
    %799 = vector.broadcast %795 : vector<1x128xf32> to vector<8x128xf32>
    %800 = arith.mulf %798, %799 : vector<8x128xf32>
    %801 = arith.addf %790, %800 : vector<8x128xf32>
    %c1_453 = arith.constant 1 : index
    %c0_454 = arith.constant 0 : index
    %802 = vector.load %arg1[%c1_453, %c0_454] : memref<12x128xf32, #tpu.memory_space<vmem>>, vector<1x128xf32>
    %c119_i32_455 = arith.constant 119 : i32
    %803 = tpu.dynamic_rotate %802 by %c119_i32_455 dim 1 : vector<1x128xf32>, i32 -> vector<1x128xf32>
    %cst_456 = arith.constant 0.000000e+00 : f32
    %804 = vector.broadcast %cst_456 : f32 to vector<1x128xf32>
    %805 = arith.select %791, %803, %804 : vector<1x128xi1>, vector<1x128xf32>
    %c17_457 = arith.constant 17 : index
    %c0_458 = arith.constant 0 : index
    %c0_459 = arith.constant 0 : index
    %806 = vector.load %arg3[%c17_457, %c0_458, %c0_459] : memref<27x8x1xf32, #tpu.memory_space<vmem>>, vector<1x8x1xf32>
    %807 = vector.shape_cast %806 : vector<1x8x1xf32> to vector<8x1xf32>
    %808 = vector.broadcast %807 : vector<8x1xf32> to vector<8x128xf32>
    %809 = vector.broadcast %805 : vector<1x128xf32> to vector<8x128xf32>
    %810 = arith.mulf %808, %809 : vector<8x128xf32>
    %811 = arith.addf %801, %810 : vector<8x128xf32>
    %c2_460 = arith.constant 2 : index
    %c0_461 = arith.constant 0 : index
    %812 = vector.load %arg1[%c2_460, %c0_461] : memref<12x128xf32, #tpu.memory_space<vmem>>, vector<1x128xf32>
    %c119_i32_462 = arith.constant 119 : i32
    %813 = tpu.dynamic_rotate %812 by %c119_i32_462 dim 1 : vector<1x128xf32>, i32 -> vector<1x128xf32>
    %cst_463 = arith.constant 0.000000e+00 : f32
    %814 = vector.broadcast %cst_463 : f32 to vector<1x128xf32>
    %815 = arith.select %791, %813, %814 : vector<1x128xi1>, vector<1x128xf32>
    %c26_464 = arith.constant 26 : index
    %c0_465 = arith.constant 0 : index
    %c0_466 = arith.constant 0 : index
    %816 = vector.load %arg3[%c26_464, %c0_465, %c0_466] : memref<27x8x1xf32, #tpu.memory_space<vmem>>, vector<1x8x1xf32>
    %817 = vector.shape_cast %816 : vector<1x8x1xf32> to vector<8x1xf32>
    %818 = vector.broadcast %817 : vector<8x1xf32> to vector<8x128xf32>
    %819 = vector.broadcast %815 : vector<1x128xf32> to vector<8x128xf32>
    %820 = arith.mulf %818, %819 : vector<8x128xf32>
    %821 = arith.addf %811, %820 : vector<8x128xf32>
    %822 = arith.maximumf %597, %657 : vector<8x128xf32>
    %823 = arith.maximumf %784, %821 : vector<8x128xf32>
    %824 = arith.maximumf %822, %823 : vector<8x128xf32>
    %c0_467 = arith.constant 0 : index
    %c0_468 = arith.constant 0 : index
    %825 = vector.load %arg4[%c0_467, %c0_468] : memref<8x1xf32, #tpu.memory_space<vmem>>, vector<8x1xf32>
    %826 = vector.broadcast %825 : vector<8x1xf32> to vector<8x128xf32>
    %827 = arith.addf %824, %826 : vector<8x128xf32>
    %cst_469 = arith.constant 0.000000e+00 : f32
    %828 = vector.broadcast %cst_469 : f32 to vector<8x128xf32>
    %829 = arith.maximumf %827, %828 : vector<8x128xf32>
    %830 = vector.extract_strided_slice %829 {offsets = [0, 0], sizes = [8, 64], strides = [1, 1]} : vector<8x128xf32> to vector<8x64xf32>
    %c0_470 = arith.constant 0 : index
    %c0_471 = arith.constant 0 : index
    %c0_472 = arith.constant 0 : index
    %831 = vector.load %arg5[%c0_470, %c0_471, %c0_472] : memref<2x8x64xf32, #tpu.memory_space<vmem>>, vector<1x8x64xf32>
    %832 = vector.shape_cast %831 : vector<1x8x64xf32> to vector<8x64xf32>
    %833 = vector.shape_cast %830 : vector<8x64xf32> to vector<1x8x64xf32>
    tpu.vector_store %arg5[%c0_470, %c0_471, %c0_472], %833 {strides = array<i32>} : memref<2x8x64xf32, #tpu.memory_space<vmem>>, vector<1x8x64xf32>,
    %834 = vector.extract_strided_slice %829 {offsets = [0, 64], sizes = [8, 64], strides = [1, 1]} : vector<8x128xf32> to vector<8x64xf32>
    %c1_473 = arith.constant 1 : index
    %c0_474 = arith.constant 0 : index
    %c0_475 = arith.constant 0 : index
    %835 = vector.load %arg5[%c1_473, %c0_474, %c0_475] : memref<2x8x64xf32, #tpu.memory_space<vmem>>, vector<1x8x64xf32>
    %836 = vector.shape_cast %835 : vector<1x8x64xf32> to vector<8x64xf32>
    %837 = vector.shape_cast %834 : vector<8x64xf32> to vector<1x8x64xf32>
    tpu.vector_store %arg5[%c1_473, %c0_474, %c0_475], %837 {strides = array<i32>} : memref<2x8x64xf32, #tpu.memory_space<vmem>>, vector<1x8x64xf32>,
    return
  }
  func.func @transform_0(%arg0: i32) -> (i32, i32) {
    %c0_i32 = arith.constant 0 : i32
    %c0_i32_0 = arith.constant 0 : i32
    return %c0_i32, %arg0 : i32, i32
  }
  func.func @transform_1(%arg0: i32) -> (i32, i32) {
    %c0_i32 = arith.constant 0 : i32
    %c0_i32_0 = arith.constant 0 : i32
    return %c0_i32, %arg0 : i32, i32
  }
  func.func @transform_2(%arg0: i32) -> (i32, i32, i32) {
    %c0_i32 = arith.constant 0 : i32
    %c0_i32_0 = arith.constant 0 : i32
    %c0_i32_1 = arith.constant 0 : i32
    %c0_i32_2 = arith.constant 0 : i32
    return %c0_i32, %c0_i32_0, %c0_i32_1 : i32, i32, i32
  }
  func.func @transform_3(%arg0: i32) -> (i32, i32) {
    %c0_i32 = arith.constant 0 : i32
    %c0_i32_0 = arith.constant 0 : i32
    %c0_i32_1 = arith.constant 0 : i32
    return %c0_i32, %c0_i32_0 : i32, i32
  }
  func.func @transform_4(%arg0: i32) -> (i32, i32, i32) {
    %c0_i32 = arith.constant 0 : i32
    %c0_i32_0 = arith.constant 0 : i32
    %c0_i32_1 = arith.constant 0 : i32
    return %arg0, %c0_i32, %c0_i32_0 : i32, i32, i32
  }
}

</mosaic_0001>

<bundles_post_ra>
// kernel: tile.9
= control target key start
LH: loop header
LB: loop body
LE: loop exit
PB: predicated region body
PF: predicated region fallthrough
CT: control target
= control target key end

     0   :  { %s10_s10 = smov 3  ;;  %vm12_vm0 = vcmask 523264   ;;  %s29_s11 = smov 64   ;;  %vm19_vm1 = vcmask 1048064   ;;  %s49_s0 = inlined_call_operand.vmem [shape: s32[2,2,64], index: 0, kind: input, shape index: {}]   ;;  %s50_s1 = inlined_call_operand.vmem [shape: s32[2,128], index: 1, kind: output, shape index: {}]  }
   0x1   :  { %v27_v0 = vld [vmem:[%s49_s0 + $0x2] sm:$0x3]  ;;  %v8_v1 = vld [vmem:[%s49_s0] sm:$0x3]  ;;  %s15_s0 = smov 3 }
   0x2   :  { %7 = vst [vmem:[#allocation1 + $0x8] sm:$0x3] %v27_v0 }
   0x3   :  { %9 = vst [vmem:[#allocation1] sm:$0x3] %v8_v1 }
   0xa   :  { %v16_v2 = vld [vmem:[#allocation1 + $0x1] ss:$8 sm:%s15_s0]   ;;  %v11_v3 = vld [vmem:[#allocation1] ss:$8 sm:%s10_s10]  }
   0xb   :  { %17 = vrot.lane.b32.xlu0 %v16_v2, %s29_s11  ;;  %13 = vst.msk [vmem:[#allocation0] sm:$0x3] %vm12_vm0, %v11_v3  }
  0x7d   :  { %v18_v4 = vpop.permute.xlu0 %17  }
  0x7e   :  { %20 = vst.msk [vmem:[#allocation0] sm:$0x3] %vm19_vm1, %v18_v4  }
  0x85   :  { %v23_v5 = vld [vmem:[#allocation0] sm:$0x3] }
  0x86   :  { %26 = vst [vmem:[%s50_s1] sm:$0x3] %v23_v5 }

// kernel: cnn_extractor_forward.1
= control target key start
LH: loop header
LB: loop body
LE: loop exit
PB: predicated region body
PF: predicated region fallthrough
CT: control target
= control target key end

     0   :  { %v674_v2 = vmov 0   ;;  %s675_s19 = smov 9   ;;  %s676_s8 = smov 8   ;;  %vm610_vm8 = vcmask 523264   ;;  %s1324_s0 = inlined_call_operand.vmem [shape: f32[12,128], index: 0, kind: input, shape index: {}]   ;;  %s1325_s2 = inlined_call_operand.vmem [shape: f32[27,8,1], index: 2, kind: input, shape index: {}]   ;;  %s1326_s1 = inlined_call_operand.vmem [shape: s32[2,128], index: 1, kind: input, shape index: {}]   ;;  %s1327_s3 = inlined_call_operand.vmem [shape: f32[8,1], index: 3, kind: input, shape index: {}]   ;;  %s1328_s4 = inlined_call_operand.vmem [shape: f32[2,8,64], index: 4, kind: output, shape index: {}]  }
   0x1   :  { %v712_v0 = vld [vmem:[%s1324_s0 + $0xb] sm:$0x1]  ;;  %v717_v1 = vld [vmem:[%s1324_s0 + $0xa] sm:$0x1]  ;;  %661 = vset.pattern.permute.xlu2 %v674_v2  ;;  %660 = vset.pattern.permute.xlu1 %v674_v2  ;;  %v724_v3 = vld [vmem:[%s1324_s0 + $0x9] sm:$0x1] }
   0x2   :  { %52 = vrot.lane.b32.xlu2 %v712_v0, %s675_s19  ;;  %38 = vrot.lane.b32.xlu1 %v717_v1, %s675_s19  ;;  %v623_v4 = vld [vmem:[%s1325_s2 + $0x90] sm:$0xff]  ;;  %v622_v5 = vld [vmem:[%s1325_s2 + $0x48] sm:$0xff]  ;;  %s677_s21 = smov 7   ;;  %s678_s28 = smov 1  }
   0x3   :  { %25 = vrot.lane.b32.xlu0 %v724_v3, %s675_s19  ;;  %v28_v6 = vld [vmem:[%s1325_s2] sm:$0xff]  ;;  %v624_v7 = vld [vmem:[%s1325_s2 + $0x8] sm:$0xff]  ;;  %v625_v11 = vld [vmem:[%s1325_s2 + $0x50] sm:$0xff]  ;;  %s681_s12 = smov 120   ;;  %s682_s5 = smov 119  }
   0x4   :  { %659 = vset.pattern.permute.xlu0 %v674_v2  ;;  %v742_v8 = vld [vmem:[%s1324_s0 + $0x6] sm:$0x1]  ;;  %v747_v9 = vld [vmem:[%s1324_s0 + $0x7] sm:$0x1]  ;;  %v754_v10 = vld [vmem:[%s1324_s0 + $0x8] sm:$0x1] }
   0x5   :  { %v626_v12 = vld [vmem:[%s1325_s2 + $0x98] sm:$0xff]  ;;  %v627_v13 = vld [vmem:[%s1325_s2 + $0x10] sm:$0xff]  ;;  %v629_v15 = vld [vmem:[%s1325_s2 + $0xa0] sm:$0xff] }
   0x6   :  { %v628_v14 = vld [vmem:[%s1325_s2 + $0x58] sm:$0xff]  ;;  %v784_v17 = vld [vmem:[%s1324_s0 + $0x3] sm:$0x1]  ;;  %v789_v18 = vld [vmem:[%s1324_s0 + $0x4] sm:$0x1] }
   0x7   :  { %v630_v16 = vld [vmem:[%s1325_s2 + $0x18] sm:$0xff]  ;;  %v798_v19 = vld [vmem:[%s1324_s0 + $0x5] sm:$0x1]  ;;  %v632_v21 = vld [vmem:[%s1325_s2 + $0xa8] sm:$0xff] }
   0x8   :  { %v631_v20 = vld [vmem:[%s1325_s2 + $0x60] sm:$0xff]  ;;  %v634_v22 = vld [vmem:[%s1325_s2 + $0x68] sm:$0xff]  ;;  %v635_v24 = vld [vmem:[%s1325_s2 + $0xb0] sm:$0xff] }
   0x9   :  { %v633_v23 = vld [vmem:[%s1325_s2 + $0x20] sm:$0xff]  ;;  %v637_v25 = vld [vmem:[%s1325_s2 + $0x70] sm:$0xff]  ;;  %v636_v26 = vld [vmem:[%s1325_s2 + $0x28] sm:$0xff] }
   0xa   :  { %59 = vperm.xlu2 %661, %v623_v4   ;;  %45 = vperm.xlu1 %660, %v622_v5   ;;  %v826_v27 = vld [vmem:[%s1324_s0] sm:$0x1]  ;;  %v837_v29 = vld [vmem:[%s1326_s1 + $0x1] sm:$0x1]  ;;  %v842_v30 = vld [vmem:[%s1324_s0 + $0x2] sm:$0x1] }
   0xb   :  { %31 = vperm.xlu0 %659, %v28_v6   ;;  %v832_v28 = vld [vmem:[%s1326_s1] sm:$0x1]  ;;  %v847_v31 = vld [vmem:[%s1324_s0 + $0x1] sm:$0x1]  ;;  %vm21_vm1 = vcmp.ge.s32.totalorder %v837_v29, 1  ;;  %v638_v45 = vld [vmem:[%s1325_s2 + $0xb8] sm:$0xff] }
   0xc   :  { %vm19_vm0 = vcmp.ge.s32.totalorder %v832_v28, 1  ;;  %v868_v35 = vld [vmem:[%s1324_s0 + $0x2] ss:$0 sm:$0xff]  ;;  %v883_v40 = vld [vmem:[%s1324_s0 + $0x3] ss:$0 sm:$0xff]  ;;  %v639_v51 = vld [vmem:[%s1325_s2 + $0x30] sm:$0xff] }
   0xd   :  { %vm859_vm2 = vmand %vm19_vm0, %vm21_vm1  ;;  %v888_v41 = vld [vmem:[%s1324_s0] ss:$0 sm:$0xff]  ;;  %v918_v54 = vld [vmem:[%s1324_s0 + $0x1] ss:$0 sm:$0xff]  ;;  %vm22_vm3 = vcmp.le.s32.totalorder %v837_v29, 6  ;;  %vm20_vm5 = vcmp.le.s32.totalorder %v832_v28, 6 }
   0xe   :  { %vm999_vm4 = vmand %vm19_vm0, %vm22_vm3 }
   0xf   :  { %vm1239_vm6 = vmand %vm20_vm5, %vm21_vm1 }
  0x10   :  { %vm1297_vm7 = vmand %vm20_vm5, %vm22_vm3 }
  0x12   :  { %73 = vperm.xlu2 %661, %v624_v7   ;;  %66 = vrot.lane.b32.xlu1 %v742_v8, %s676_s8 }
  0x13   :  { %82 = vrot.lane.b32.xlu0 %v747_v9, %s676_s8 }
  0x1a   :  { %98 = vrot.lane.b32.xlu2 %v754_v10, %s676_s8  ;;  %89 = vperm.xlu1 %660, %v625_v11  }
  0x1b   :  { %105 = vperm.xlu0 %659, %v626_v12  }
  0x22   :  { %120 = vperm.xlu2 %661, %v627_v13   ;;  %113 = vrot.lane.b32.xlu1 %v724_v3, %s676_s8 }
  0x23   :  { %128 = vrot.lane.b32.xlu0 %v717_v1, %s676_s8 }
  0x2a   :  { %143 = vrot.lane.b32.xlu2 %v712_v0, %s676_s8  ;;  %135 = vperm.xlu1 %660, %v628_v14  }
  0x2b   :  { %150 = vperm.xlu0 %659, %v629_v15   ;;  %v641_v15 = vld [vmem:[%s1325_s2 + $0xc0] sm:$0xff] }
  0x32   :  { %165 = vrot.lane.b32.xlu2 %v747_v9, %s677_s21  ;;  %159 = vrot.lane.b32.xlu1 %v742_v8, %s677_s21 }
  0x33   :  { %171 = vrot.lane.b32.xlu0 %v754_v10, %s677_s21  ;;  %s679_s21 = smov 127  }
  0x3a   :  { %185 = vperm.xlu2 %661, %v630_v16   ;;  %178 = vrot.lane.b32.xlu1 %v784_v17, %s678_s28 }
  0x3b   :  { %194 = vrot.lane.b32.xlu0 %v789_v18, %s678_s28 }
  0x42   :  { %210 = vrot.lane.b32.xlu2 %v798_v19, %s678_s28  ;;  %201 = vperm.xlu1 %660, %v631_v20   ;;  %v642_v20 = vld [vmem:[%s1325_s2 + $0x38] sm:$0xff] }
  0x43   :  { %217 = vperm.xlu0 %659, %v632_v21   ;;  %v963_v21 = vld [vmem:[%s1324_s0 + $0x4] ss:$0 sm:$0xff] }
  0x4a   :  { %247 = vperm.xlu2 %661, %v634_v22   ;;  %230 = vperm.xlu1 %660, %v633_v23  }
  0x4b   :  { %264 = vperm.xlu0 %659, %v635_v24  }
  0x52   :  { %296 = vperm.xlu2 %661, %v637_v25   ;;  %280 = vperm.xlu1 %660, %v636_v26   ;;  %v972_v25 = vld [vmem:[%s1324_s0 + $0x5] ss:$0 sm:$0xff] }
  0x53   :  { %324 = vrot.lane.b32.xlu0 %v826_v27, %s679_s21 }
  0x5a   :  { %340 = vrot.lane.b32.xlu2 %v842_v30, %s679_s21  ;;  %332 = vrot.lane.b32.xlu1 %v847_v31, %s679_s21 }
  0x5b   :  { %348 = vrot.lane.b32.xlu0 %v724_v3, %s678_s28 }
  0x5c   :  { %v53_v33 = vpop.permute.xlu2 %52 }
  0x5d   :  { %v54_v34 = vsel %vm859_vm2, %v53_v33, 0.0 }
  0x5e   :  { %v62_v36 = vperm.slane %v54_v34, 0 }
  0x62   :  { %378 = vrot.lane.b32.xlu2 %v712_v0, %s678_s28  ;;  %363 = vrot.lane.b32.xlu1 %v717_v1, %s678_s28  ;;  %s680_s28 = smov 121   ;;  %v640_v1 = vld [vmem:[%s1325_s2 + $0x78] sm:$0xff] }
  0x63   :  { %489 = vrot.lane.b32.xlu0 %v742_v8, %s679_s21 }
  0x64   :  { %v875_v37 = vpop.permute.xlu2 %59 }
  0x65   :  { %v63_v38 = vmul.f32 %v62_v36, %v875_v37  ;;  %v274_v39 = vmul.f32 %v868_v35, %v875_v37 }
  0x6a   :  { %505 = vrot.lane.b32.xlu2 %v754_v10, %s679_s21  ;;  %497 = vrot.lane.b32.xlu1 %v747_v9, %s679_s21 }
  0x6b   :  { %514 = vrot.lane.b32.xlu0 %v784_v17, %s680_s28 }
  0x6c   :  { %v893_v42 = vpop.permute.xlu2 %73 }
  0x6d   :  { %v897_v43 = vmul.f32 %v888_v41, %v893_v42  ;;  %v290_v44 = vmul.f32 %v883_v40, %v893_v42 }
  0x72   :  { %312 = vperm.xlu2 %661, %v638_v45   ;;  %532 = vrot.lane.b32.xlu1 %v826_v27, %s681_s12 }
  0x73   :  { %520 = vrot.lane.b32.xlu0 %v789_v18, %s680_s28 }
  0x74   :  { %v99_v46 = vpop.permute.xlu2 %98  ;;  %v39_v47 = vpop.permute.xlu1 %38 }
  0x75   :  { %v100_v48 = vsel %vm19_vm0, %v99_v46, 0.0  ;;  %v26_v49 = vpop.permute.xlu0 %25  ;;  %v40_v53 = vsel %vm859_vm2, %v39_v47, 0.0 }
  0x76   :  { %v108_v50 = vperm.slane %v100_v48, 0  ;;  %v27_v55 = vsel %vm859_vm2, %v26_v49, 0.0  ;;  %v48_v56 = vperm.slane %v40_v53, 0  ;;  %v643_v49 = vld [vmem:[%s1325_s2 + $0x80] sm:$0xff] }
  0x77   :  { %v34_v57 = vperm.slane %v27_v55, 0  ;;  %v989_v53 = vld [vmem:[%s1324_s0 + $0x6] ss:$0 sm:$0xff] }
  0x78   :  { %v111_v52 = vmul.f32 %v108_v50, %v875_v37 }
  0x7a   :  { %355 = vperm.xlu2 %661, %v639_v51   ;;  %540 = vrot.lane.b32.xlu1 %v847_v31, %s681_s12 }
  0x7b   :  { %526 = vrot.lane.b32.xlu0 %v798_v19, %s680_s28 }
  0x7c   :  { %v925_v58 = vpop.permute.xlu2 %120  ;;  %v927_v59 = vpop.permute.xlu1 %45 }
  0x7d   :  { %v49_v60 = vmul.f32 %v48_v56, %v927_v59  ;;  %v257_v61 = vmul.f32 %v918_v54, %v927_v59  ;;  %v932_v62 = vpop.permute.xlu0 %31 }
  0x7e   :  { %v35_v63 = vmul.f32 %v34_v57, %v932_v62  ;;  %v240_v0 = vmul.f32 %v888_v41, %v932_v62 }
  0x80   :  { %v50_v2 = vadd.f32 %v49_v60, %v35_v63  ;;  %v258_v3 = vadd.f32 %v257_v61, %v240_v0 }
  0x82   :  { %v275_v4 = vadd.f32 %v274_v39, %v258_v3  ;;  %370 = vperm.xlu2 %661, %v640_v1   ;;  %548 = vrot.lane.b32.xlu1 %v842_v30, %s681_s12  ;;  %v64_v5 = vadd.f32 %v63_v38, %v50_v2  ;;  %v644_v3 = vld [vmem:[%s1325_s2 + $0xc8] sm:$0xff] }
  0x83   :  { %556 = vrot.lane.b32.xlu0 %v784_v17, %s681_s12 }
  0x84   :  { %v144_v6 = vpop.permute.xlu2 %143  ;;  %v67_v7 = vpop.permute.xlu1 %66  ;;  %v291_v8 = vadd.f32 %v290_v44, %v275_v4 }
  0x85   :  { %v68_v9 = vsel %vm19_vm0, %v67_v7, 0.0  ;;  %v83_v10 = vpop.permute.xlu0 %82  ;;  %v950_v13 = vsel %vm19_vm0, %v144_v6, 0.0  ;;  %v645_v6 = vld [vmem:[%s1325_s2 + $0x40] sm:$0xff] }
  0x86   :  { %v76_v11 = vperm.slane %v68_v9, 0  ;;  %v84_v12 = vsel %vm19_vm0, %v83_v10, 0.0  ;;  %v153_v23 = vperm.slane %v950_v13, 0 }
  0x87   :  { %v92_v14 = vperm.slane %v84_v12, 0 }
  0x88   :  { %v77_v16 = vmul.f32 %v76_v11, %v893_v42  ;;  %v79_v17 = vmul.f32 %v76_v11, %v932_v62 }
  0x89   :  { %v95_v22 = vmul.f32 %v92_v14, %v927_v59 }
  0x8a   :  { %v78_v24 = vadd.f32 %v77_v16, %v64_v5  ;;  %564 = vrot.lane.b32.xlu2 %v789_v18, %s681_s12  ;;  %385 = vperm.xlu1 %660, %v641_v15  }
  0x8b   :  { %v96_v26 = vadd.f32 %v95_v22, %v79_v17  ;;  %397 = vperm.xlu0 %659, %v642_v20  }
  0x8c   :  { %v166_v32 = vpop.permute.xlu2 %165  ;;  %v90_v33 = vpop.permute.xlu1 %89 }
  0x8d   :  { %v93_v34 = vmul.f32 %v92_v14, %v90_v33  ;;  %v975_v36 = vmul.f32 %v918_v54, %v90_v33  ;;  %v306_v38 = vmul.f32 %v963_v21, %v90_v33  ;;  %v106_v39 = vpop.permute.xlu0 %105  ;;  %v112_v51 = vadd.f32 %v111_v52, %v96_v26  ;;  %v647_v26 = vld [vmem:[%s1325_s2 + $0xd0] sm:$0xff] }
  0x8e   :  { %v109_v44 = vmul.f32 %v108_v50, %v106_v39  ;;  %v156_v45 = vmul.f32 %v153_v23, %v106_v39  ;;  %v979_v18 = vmul.f32 %v868_v35, %v106_v39  ;;  %v322_v48 = vmul.f32 %v972_v25, %v106_v39 }
  0x8f   :  { %v94_v46 = vadd.f32 %v93_v34, %v78_v24  ;;  %v307_v47 = vadd.f32 %v306_v38, %v291_v8  ;;  %v167_v0 = vsel %vm999_vm4, %v166_v32, 0.0  ;;  %v646_v24 = vld [vmem:[%s1325_s2 + $0x88] sm:$0xff] }
  0x90   :  { %v168_v7 = vperm.slane %v167_v0, 0  ;;  %v1055_v32 = vld [vmem:[%s1324_s0 + $0xa] ss:$0 sm:$0xff] }
  0x91   :  { %v110_v50 = vadd.f32 %v109_v44, %v94_v46  ;;  %v991_v55 = vadd.f32 %v322_v48, %v307_v47 }
  0x92   :  { %413 = vperm.xlu2 %661, %v643_v49   ;;  %572 = vrot.lane.b32.xlu1 %v798_v19, %s681_s12 }
  0x93   :  { %581 = vrot.lane.b32.xlu0 %v826_v27, %s682_s5 }
  0x94   :  { %v1005_v56 = vpop.permute.xlu2 %185  ;;  %v114_v57 = vpop.permute.xlu1 %113 }
  0x95   :  { %v1009_v60 = vmul.f32 %v888_v41, %v1005_v56  ;;  %v1013_v19 = vmul.f32 %v989_v53, %v1005_v56  ;;  %v115_v61 = vsel %vm19_vm0, %v114_v57, 0.0  ;;  %v129_v63 = vpop.permute.xlu0 %128 }
  0x96   :  { %v123_v1 = vperm.slane %v115_v61, 0  ;;  %v130_v27 = vsel %vm19_vm0, %v129_v63, 0.0 }
  0x97   :  { %v138_v2 = vperm.slane %v130_v27, 0 }
  0x98   :  { %v124_v4 = vmul.f32 %v123_v1, %v925_v58  ;;  %v126_v5 = vmul.f32 %v123_v1, %v893_v42 }
  0x99   :  { %v141_v8 = vmul.f32 %v138_v2, %v90_v33 }
  0x9a   :  { %v125_v9 = vadd.f32 %v124_v4, %v110_v50  ;;  %v127_v10 = vadd.f32 %v126_v5, %v112_v51  ;;  %587 = vrot.lane.b32.xlu2 %v847_v31, %s682_s5  ;;  %429 = vperm.xlu1 %660, %v644_v3   ;;  %v602_v50 = vld [vmem:[%s1327_s3] sm:$0xff] }
  0x9b   :  { %445 = vperm.xlu0 %659, %v645_v6  }
  0x9c   :  { %v142_v11 = vadd.f32 %v141_v8, %v127_v10  ;;  %v211_v12 = vpop.permute.xlu2 %210  ;;  %v1031_v13 = vpop.permute.xlu1 %135 }
  0x9d   :  { %v139_v14 = vmul.f32 %v138_v2, %v1031_v13  ;;  %v169_v42 = vmul.f32 %v168_v7, %v1031_v13  ;;  %v1037_v15 = vmul.f32 %v963_v21, %v1031_v13  ;;  %v1039_v16 = vpop.permute.xlu0 %150  ;;  %v212_v0 = vsel %vm21_vm1, %v211_v12, 0.0 }
  0x9e   :  { %v154_v17 = vmul.f32 %v153_v23, %v1039_v16  ;;  %v1044_v31 = vmul.f32 %v972_v25, %v1039_v16  ;;  %v157_v20 = vadd.f32 %v156_v45, %v142_v11  ;;  %v1060_v23 = vld [vmem:[%s1324_s0 + $0x7] ss:$0 sm:$0xff]  ;;  %v220_v6 = vperm.slane %v212_v0, 0 }
  0x9f   :  { %v140_v22 = vadd.f32 %v139_v14, %v125_v9 }
  0xa1   :  { %v155_v33 = vadd.f32 %v154_v17, %v140_v22  ;;  %v223_v17 = vmul.f32 %v220_v6, %v875_v37 }
  0xa2   :  { %461 = vperm.xlu2 %661, %v646_v24   ;;  %593 = vrot.lane.b32.xlu1 %v842_v30, %s682_s5 }
  0xa3   :  { %477 = vperm.xlu0 %659, %v647_v26  }
  0xa4   :  { %v248_v34 = vpop.permute.xlu2 %247  ;;  %v160_v38 = vpop.permute.xlu1 %159 }
  0xa5   :  { %v1065_v39 = vmul.f32 %v918_v54, %v248_v34  ;;  %v1068_v44 = vmul.f32 %v963_v21, %v248_v34  ;;  %v1071_v45 = vmul.f32 %v1060_v23, %v248_v34  ;;  %v1074_v46 = vmul.f32 %v1055_v32, %v248_v34  ;;  %v172_v47 = vpop.permute.xlu0 %171 }
  0xa6   :  { %v161_v48 = vsel %vm999_vm4, %v160_v38, 0.0  ;;  %v173_v30 = vsel %vm999_vm4, %v172_v47, 0.0 }
  0xa7   :  { %v162_v49 = vperm.slane %v161_v48, 0  ;;  %v174_v51 = vperm.slane %v173_v30, 0 }
  0xa9   :  { %v163_v57 = vmul.f32 %v162_v49, %v925_v58  ;;  %v175_v61 = vmul.f32 %v174_v51, %v1039_v16 }
  0xaa   :  { %605 = vperm.xlu1 %660, %v602_v50   ;;  %v1126_v50 = vld [vmem:[%s1324_s0 + $0xb] ss:$0 sm:$0xff] }
  0xab   :  { %v164_v63 = vadd.f32 %v163_v57, %v157_v20 }
  0xac   :  { %v1087_v1 = vpop.permute.xlu2 %296  ;;  %v179_v27 = vpop.permute.xlu1 %178 }
  0xad   :  { %v170_v52 = vadd.f32 %v169_v42, %v164_v63  ;;  %v180_v2 = vsel %vm21_vm1, %v179_v27, 0.0  ;;  %v195_v3 = vpop.permute.xlu0 %194  ;;  %v1100_v42 = vld [vmem:[%s1324_s0 + $0x8] ss:$0 sm:$0xff] }
  0xae   :  { %v188_v4 = vperm.slane %v180_v2, 0  ;;  %v196_v5 = vsel %vm21_vm1, %v195_v3, 0.0 }
  0xaf   :  { %v176_v7 = vadd.f32 %v175_v61, %v170_v52  ;;  %v204_v8 = vperm.slane %v196_v5, 0 }
  0xb0   :  { %v189_v9 = vmul.f32 %v188_v4, %v1005_v56  ;;  %v191_v10 = vmul.f32 %v188_v4, %v932_v62 }
  0xb1   :  { %v237_v11 = vadd.f32 %v1009_v60, %v176_v7  ;;  %v207_v12 = vmul.f32 %v204_v8, %v927_v59 }
  0xb2   :  { %v190_v14 = vadd.f32 %v189_v9, %v155_v33 }
  0xb3   :  { %v208_v20 = vadd.f32 %v207_v12, %v191_v10 }
  0xb4   :  { %v341_v22 = vpop.permute.xlu2 %340  ;;  %v1103_v24 = vpop.permute.xlu1 %201 }
  0xb5   :  { %v224_v26 = vadd.f32 %v223_v17, %v208_v20  ;;  %v205_v34 = vmul.f32 %v204_v8, %v1103_v24  ;;  %v253_v62 = vmul.f32 %v918_v54, %v1103_v24  ;;  %v1108_v60 = vpop.permute.xlu0 %217  ;;  %v1112_v59 = vmul.f32 %v1060_v23, %v1103_v24 }
  0xb6   :  { %v221_v33 = vmul.f32 %v220_v6, %v1108_v60  ;;  %v270_v37 = vmul.f32 %v868_v35, %v1108_v60  ;;  %v1120_v30 = vmul.f32 %v1100_v42, %v1108_v60 }
  0xb7   :  { %v239_v38 = vadd.f32 %v897_v43, %v224_v26  ;;  %v206_v47 = vadd.f32 %v205_v34, %v190_v14  ;;  %v254_v48 = vadd.f32 %v253_v62, %v237_v11  ;;  %v342_v34 = vsel %vm22_vm3, %v341_v22, 0.0 }
  0xb9   :  { %v256_v54 = vadd.f32 %v975_v36, %v239_v38  ;;  %v222_v49 = vadd.f32 %v221_v33, %v206_v47  ;;  %v271_v51 = vadd.f32 %v270_v37, %v254_v48  ;;  %v288_v36 = vmul.f32 %v883_v40, %v925_v58 }
  0xba   :  { %v343_v47 = vperm.slane %v342_v34, 0 }
  0xbb   :  { %v273_v57 = vadd.f32 %v979_v18, %v256_v54 }
  0xbc   :  { %v379_v61 = vpop.permute.xlu2 %378  ;;  %v1129_v63 = vpop.permute.xlu1 %230 }
  0xbd   :  { %v234_v43 = vmul.f32 %v888_v41, %v1129_v63  ;;  %v286_v0 = vmul.f32 %v883_v40, %v1129_v63  ;;  %v265_v27 = vpop.permute.xlu0 %264  ;;  %v289_v41 = vadd.f32 %v288_v36, %v273_v57 }
  0xbe   :  { %v268_v52 = vmul.f32 %v868_v35, %v265_v27  ;;  %v318_v2 = vmul.f32 %v972_v25, %v265_v27  ;;  %v1140_v18 = vmul.f32 %v1100_v42, %v265_v27  ;;  %v1143_v5 = vmul.f32 %v1126_v50, %v265_v27 }
  0xbf   :  { %v235_v3 = vadd.f32 %v234_v43, %v222_v49  ;;  %v287_v4 = vadd.f32 %v286_v0, %v271_v51  ;;  %v305_v8 = vadd.f32 %v1037_v15, %v289_v41  ;;  %v346_v0 = vmul.f32 %v343_v47, %v1039_v16 }
  0xc1   :  { %v252_v6 = vadd.f32 %v1065_v39, %v235_v3  ;;  %v303_v7 = vadd.f32 %v1068_v44, %v287_v4  ;;  %v321_v12 = vadd.f32 %v1044_v31, %v305_v8  ;;  %v300_v39 = vmul.f32 %v963_v21, %v1087_v1 }
  0xc2   :  { %v1186_v3 = vsel %vm21_vm1, %v379_v61, 0.0 }
  0xc3   :  { %v269_v9 = vadd.f32 %v268_v52, %v252_v6  ;;  %v319_v10 = vadd.f32 %v318_v2, %v303_v7  ;;  %v1197_v7 = vld [vmem:[%s1324_s0 + $0x9] ss:$0 sm:$0xff]  ;;  %v388_v61 = vperm.slane %v1186_v3, 0  ;;  %s683_s0 = smov 64  }
  0xc4   :  { %v1148_v35 = vpop.permute.xlu2 %505  ;;  %v1150_v11 = vpop.permute.xlu1 %280 }
  0xc5   :  { %v284_v14 = vmul.f32 %v883_v40, %v1150_v11  ;;  %v325_v17 = vpop.permute.xlu0 %324 }
  0xc6   :  { %v326_v20 = vsel %vm22_vm3, %v325_v17, 0.0  ;;  %v391_v17 = vmul.f32 %v388_v61, %v1108_v60 }
  0xc7   :  { %v285_v44 = vadd.f32 %v284_v14, %v269_v9  ;;  %v327_v15 = vperm.slane %v326_v20, 0  ;;  %v455_v20 = vmul.f32 %v1197_v7, %v1129_v63 }
  0xc9   :  { %v301_v26 = vadd.f32 %v300_v39, %v285_v44  ;;  %v328_v62 = vmul.f32 %v327_v15, %v1150_v11  ;;  %v330_v40 = vmul.f32 %v327_v15, %v925_v58 }
  0xcb   :  { %v329_v51 = vadd.f32 %v328_v62, %v319_v10  ;;  %v331_v58 = vadd.f32 %v330_v40, %v991_v55 }
  0xcc   :  { %v1162_v33 = vpop.permute.xlu2 %312  ;;  %v333_v31 = vpop.permute.xlu1 %332 }
  0xcd   :  { %v316_v37 = vmul.f32 %v972_v25, %v1162_v33  ;;  %v349_v38 = vpop.permute.xlu0 %348  ;;  %v334_v21 = vsel %vm22_vm3, %v333_v31, 0.0  ;;  %v344_v27 = vmul.f32 %v343_v47, %v1162_v33 }
  0xce   :  { %v1171_v48 = vsel %vm21_vm1, %v349_v38, 0.0  ;;  %v335_v54 = vperm.slane %v334_v21, 0  ;;  %v453_v38 = vmul.f32 %v1197_v7, %v1150_v11  ;;  %v469_v21 = vmul.f32 %v1055_v32, %v1087_v1 }
  0xcf   :  { %v1173_v22 = vadd.f32 %v316_v37, %v301_v26  ;;  %v358_v49 = vperm.slane %v1171_v48, 0 }
  0xd0   :  { %v336_v57 = vmul.f32 %v335_v54, %v1087_v1  ;;  %v338_v25 = vmul.f32 %v335_v54, %v1031_v13 }
  0xd1   :  { %v361_v43 = vmul.f32 %v358_v49, %v1005_v56 }
  0xd2   :  { %v337_v36 = vadd.f32 %v336_v57, %v329_v51  ;;  %v339_v52 = vadd.f32 %v338_v25, %v331_v58  ;;  %v485_v58 = vmul.f32 %v1126_v50, %v1162_v33 }
  0xd3   :  { %v362_v2 = vadd.f32 %v361_v43, %v321_v12 }
  0xd4   :  { %v1188_v55 = vpop.permute.xlu2 %355  ;;  %v364_v4 = vpop.permute.xlu1 %363  ;;  %v345_v41 = vadd.f32 %v344_v27, %v337_v36  ;;  %v347_v13 = vadd.f32 %v346_v0, %v339_v52  ;;  %v1246_v36 = vsel %vm22_vm3, %v1148_v35, 0.0 }
  0xd5   :  { %v403_v6 = vmul.f32 %v989_v53, %v1188_v55  ;;  %v490_v56 = vpop.permute.xlu0 %489  ;;  %v365_v16 = vsel %vm21_vm1, %v364_v4, 0.0  ;;  %v359_v35 = vmul.f32 %v358_v49, %v1188_v55 }
  0xd6   :  { %v408_v8 = vadd.f32 %v1013_v19, %v347_v13  ;;  %v373_v10 = vperm.slane %v365_v16, 0  ;;  %v405_v19 = vmul.f32 %v989_v53, %v1129_v63  ;;  %v508_v16 = vperm.slane %v1246_v36, 0 }
  0xd7   :  { %v404_v9 = vadd.f32 %v403_v6, %v345_v41 }
  0xd8   :  { %v424_v12 = vadd.f32 %v1112_v59, %v408_v8  ;;  %v376_v14 = vmul.f32 %v373_v10, %v1103_v24 }
  0xda   :  { %v377_v39 = vadd.f32 %v376_v14, %v362_v2  ;;  %v440_v44 = vadd.f32 %v1120_v30, %v424_v12 }
  0xdc   :  { %v1209_v15 = vpop.permute.xlu2 %370  ;;  %v498_v26 = vpop.permute.xlu1 %497  ;;  %v392_v34 = vadd.f32 %v391_v17, %v377_v39  ;;  %v456_v59 = vadd.f32 %v455_v20, %v440_v44 }
  0xdd   :  { %v419_v24 = vmul.f32 %v1060_v23, %v1209_v15  ;;  %v515_v62 = vpop.permute.xlu0 %514  ;;  %v1233_v0 = vsel %vm22_vm3, %v498_v26, 0.0  ;;  %v374_v17 = vmul.f32 %v373_v10, %v1209_v15 }
  0xde   :  { %v406_v31 = vadd.f32 %v405_v19, %v392_v34  ;;  %v472_v60 = vadd.f32 %v1074_v46, %v456_v59  ;;  %v500_v2 = vperm.slane %v1233_v0, 0  ;;  %v516_v4 = vsel %vm1239_vm6, %v515_v62, 0.0 }
  0xdf   :  { %v420_v40 = vadd.f32 %v419_v24, %v404_v9  ;;  %v517_v8 = vperm.slane %v516_v4, 0  ;;  %v360_v19 = vadd.f32 %v359_v35, %v1173_v22 }
  0xe0   :  { %v422_v37 = vadd.f32 %v1071_v45, %v406_v31  ;;  %v488_v30 = vadd.f32 %v1143_v5, %v472_v60  ;;  %v1227_v45 = vsel %vm22_vm3, %v490_v56, 0.0 }
  0xe1   :  { %v518_v48 = vmul.f32 %v517_v8, %v1188_v55  ;;  %v375_v60 = vadd.f32 %v374_v17, %v360_v19 }
  0xe2   :  { %v438_v47 = vadd.f32 %v1140_v18, %v422_v37  ;;  %v492_v18 = vperm.slane %v1227_v45, 0 }
  0xe4   :  { %v533_v63 = vpop.permute.xlu1 %532  ;;  %v454_v54 = vadd.f32 %v453_v38, %v438_v47  ;;  %v565_v43 = vpop.permute.xlu2 %564  ;;  %v495_v52 = vmul.f32 %v492_v18, %v1150_v11  ;;  %v503_v11 = vmul.f32 %v500_v2, %v1087_v1  ;;  %v511_v1 = vmul.f32 %v508_v16, %v1162_v33 }
  0xe5   :  { %v521_v51 = vpop.permute.xlu0 %520  ;;  %v534_v56 = vsel %vm20_vm5, %v533_v63, 0.0 }
  0xe6   :  { %v470_v46 = vadd.f32 %v469_v21, %v454_v54  ;;  %v496_v6 = vadd.f32 %v495_v52, %v488_v30  ;;  %v522_v9 = vsel %vm1239_vm6, %v521_v51, 0.0  ;;  %v535_v14 = vperm.slane %v534_v56, 0 }
  0xe7   :  { %v523_v49 = vperm.slane %v522_v9, 0 }
  0xe8   :  { %v486_v57 = vadd.f32 %v485_v58, %v470_v46  ;;  %v504_v20 = vadd.f32 %v503_v11, %v496_v6  ;;  %v538_v24 = vmul.f32 %v535_v14, %v1188_v55  ;;  %v566_v6 = vsel %vm20_vm5, %v565_v43, 0.0 }
  0xe9   :  { %v524_v33 = vmul.f32 %v523_v49, %v1209_v15  ;;  %v567_v11 = vperm.slane %v566_v6, 0 }
  0xea   :  { %v519_v10 = vadd.f32 %v518_v48, %v486_v57  ;;  %v512_v37 = vadd.f32 %v511_v1, %v504_v20 }
  0xec   :  { %v541_v25 = vpop.permute.xlu1 %540  ;;  %v414_v39 = vpop.permute.xlu2 %413  ;;  %v539_v58 = vadd.f32 %v538_v24, %v512_v37  ;;  %v525_v46 = vadd.f32 %v524_v33, %v519_v10 }
  0xed   :  { %v527_v5 = vpop.permute.xlu0 %526  ;;  %v542_v12 = vsel %vm20_vm5, %v541_v25, 0.0  ;;  %v417_v57 = vmul.f32 %v1060_v23, %v414_v39  ;;  %v467_v3 = vmul.f32 %v1055_v32, %v414_v39  ;;  %v570_v48 = vmul.f32 %v567_v11, %v414_v39 }
  0xee   :  { %v528_v44 = vsel %vm1239_vm6, %v527_v5, 0.0  ;;  %v543_v26 = vperm.slane %v542_v12, 0 }
  0xef   :  { %v529_v62 = vperm.slane %v528_v44, 0 }
  0xf0   :  { %v546_v22 = vmul.f32 %v543_v26, %v1209_v15  ;;  %v544_v20 = vmul.f32 %v543_v26, %v414_v39 }
  0xf2   :  { %v547_v27 = vadd.f32 %v546_v22, %v539_v58 }
  0xf4   :  { %v549_v41 = vpop.permute.xlu1 %548  ;;  %v588_v52 = vpop.permute.xlu2 %587 }
  0xf5   :  { %v557_v13 = vpop.permute.xlu0 %556  ;;  %v550_v34 = vsel %vm20_vm5, %v549_v41, 0.0 }
  0xf6   :  { %v551_v47 = vperm.slane %v550_v34, 0  ;;  %v558_v15 = vsel %vm20_vm5, %v557_v13, 0.0 }
  0xf7   :  { %v559_v8 = vperm.slane %v558_v15, 0 }
  0xfc   :  { %v386_v59 = vpop.permute.xlu1 %385  ;;  %v462_v24 = vpop.permute.xlu2 %461 }
  0xfd   :  { %v398_v31 = vpop.permute.xlu0 %397  ;;  %v389_v30 = vmul.f32 %v388_v61, %v386_v59  ;;  %v435_v38 = vmul.f32 %v1100_v42, %v386_v59  ;;  %v530_v63 = vmul.f32 %v529_v62, %v386_v59  ;;  %v554_v61 = vmul.f32 %v551_v47, %v386_v59 }
  0xfe   :  { %v401_v51 = vmul.f32 %v989_v53, %v398_v31  ;;  %v451_v55 = vmul.f32 %v1197_v7, %v398_v31  ;;  %v536_v35 = vmul.f32 %v535_v14, %v398_v31  ;;  %v562_v12 = vmul.f32 %v559_v8, %v398_v31 }
  0xff   :  { %v390_v21 = vadd.f32 %v389_v30, %v375_v60  ;;  %v436_v54 = vadd.f32 %v435_v38, %v420_v40  ;;  %v531_v4 = vadd.f32 %v530_v63, %v525_v46  ;;  %v555_v23 = vadd.f32 %v554_v61, %v547_v27 }
 0x100   :  { %v589_v14 = vsel %vm1297_vm7, %v588_v52, 0.0  ;;  %v568_v46 = vmul.f32 %v567_v11, %v462_v24 }
 0x101   :  { %v402_v25 = vadd.f32 %v401_v51, %v390_v21  ;;  %v452_v5 = vadd.f32 %v451_v55, %v436_v54  ;;  %v537_v9 = vadd.f32 %v536_v35, %v531_v4  ;;  %v563_v43 = vadd.f32 %v562_v12, %v555_v23 }
 0x102   :  { %v590_v30 = vperm.slane %v589_v14, 0  ;;  %v501_v54 = vmul.f32 %v500_v2, %v462_v24 }
 0x103   :  { %v418_v41 = vadd.f32 %v417_v57, %v402_v25  ;;  %v468_v53 = vadd.f32 %v467_v3, %v452_v5  ;;  %v545_v19 = vadd.f32 %v544_v20, %v537_v9  ;;  %v571_v26 = vadd.f32 %v570_v48, %v563_v43 }
 0x104   :  { %v573_v40 = vpop.permute.xlu1 %572  ;;  %v591_v57 = vmul.f32 %v590_v30, %v462_v24 }
 0x105   :  { %v582_v56 = vpop.permute.xlu0 %581  ;;  %v574_v17 = vsel %vm20_vm5, %v573_v40, 0.0 }
 0x106   :  { %v575_v44 = vperm.slane %v574_v17, 0  ;;  %v583_v49 = vsel %vm1297_vm7, %v582_v56, 0.0 }
 0x107   :  { %v584_v38 = vperm.slane %v583_v49, 0 }
 0x10c   :  { %v430_v1 = vpop.permute.xlu1 %429 }
 0x10d   :  { %v433_v29 = vmul.f32 %v1100_v42, %v430_v1  ;;  %v483_v28 = vmul.f32 %v1126_v50, %v430_v1  ;;  %v552_v34 = vmul.f32 %v551_v47, %v430_v1  ;;  %v578_v59 = vmul.f32 %v575_v44, %v430_v1  ;;  %v446_v10 = vpop.permute.xlu0 %445 }
 0x10e   :  { %v449_v62 = vmul.f32 %v1197_v7, %v446_v10  ;;  %v493_v37 = vmul.f32 %v492_v18, %v446_v10  ;;  %v465_v42 = vmul.f32 %v1055_v32, %v462_v24  ;;  %v560_v47 = vmul.f32 %v559_v8, %v446_v10 }
 0x10f   :  { %v434_v39 = vadd.f32 %v433_v29, %v418_v41  ;;  %v484_v31 = vadd.f32 %v483_v28, %v468_v53  ;;  %v553_v60 = vadd.f32 %v552_v34, %v545_v19  ;;  %v579_v33 = vadd.f32 %v578_v59, %v571_v26 }
 0x110   :  { %v585_v21 = vmul.f32 %v584_v38, %v446_v10 }
 0x111   :  { %v450_v22 = vadd.f32 %v449_v62, %v434_v39  ;;  %v494_v63 = vadd.f32 %v493_v37, %v484_v31  ;;  %v561_v51 = vadd.f32 %v560_v47, %v553_v60 }
 0x112   :  { %v586_v55 = vadd.f32 %v585_v21, %v579_v33 }
 0x113   :  { %v466_v7 = vadd.f32 %v465_v42, %v450_v22  ;;  %v502_v3 = vadd.f32 %v501_v54, %v494_v63  ;;  %v569_v0 = vadd.f32 %v568_v46, %v561_v51 }
 0x114   :  { %v594_v58 = vpop.permute.xlu1 %593  ;;  %v592_v27 = vadd.f32 %v591_v57, %v586_v55 }
 0x115   :  { %v595_v45 = vsel %vm1297_vm7, %v594_v58, 0.0  ;;  %v478_v18 = vpop.permute.xlu0 %477 }
 0x116   :  { %v596_v61 = vperm.slane %v595_v45, 0  ;;  %v481_v32 = vmul.f32 %v1126_v50, %v478_v18  ;;  %v509_v25 = vmul.f32 %v508_v16, %v478_v18  ;;  %v576_v5 = vmul.f32 %v575_v44, %v478_v18 }
 0x118   :  { %v482_v2 = vadd.f32 %v481_v32, %v466_v7  ;;  %v510_v15 = vadd.f32 %v509_v25, %v502_v3  ;;  %v597_v52 = vmul.f32 %v596_v61, %v478_v18  ;;  %v577_v4 = vadd.f32 %v576_v5, %v569_v0 }
 0x11a   :  { %v598_v40 = vadd.f32 %v597_v52, %v592_v27  ;;  %v599_v41 = vmax.f32 %v482_v2, %v510_v15 }
 0x11c   :  { %v600_v53 = vmax.f32 %v577_v4, %v598_v40  ;;  %v606_v56 = vpop.permute.xlu1 %605 }
 0x11e   :  { %v601_v6 = vmax.f32 %v599_v41, %v600_v53 }
 0x120   :  { %v608_v8 = vadd.f32 %v606_v56, %v601_v6 }
 0x122   :  { %v609_v23 = vmax.f32 %v608_v8, 0.0 }
 0x124   :  { %613 = vrot.lane.b32.xlu2 %v609_v23, %s683_s0  ;;  %611 = vst.msk [vmem:[%s1328_s4] sm:$0xff] %vm610_vm8, %v609_v23 }
 0x17e   :  { %v614_v50 = vpop.permute.xlu2 %613 }
 0x17f   :  { %648 = vst.msk [vmem:[%s1328_s4 + $0x8] sm:$0xff] %vm610_vm8, %v614_v50 }

</bundles_post_ra>
